<compile_context>
chip_gen: v7x
topology: tpu7x:2x2x1
jax: 0.10.0
libtpu: 0.0.40
codegen_flags: <defaults>
</compile_context>

<pallas_src>
import functools

import jax
import jax.numpy as jnp
from jax.experimental import pallas as pl
from jax.experimental.pallas import tpu as pltpu


# ----------------------------------------------------------------------------
# helper: single-shot pallas_call with full-array blocks
# ----------------------------------------------------------------------------
def _zero_index_map(ndim):
    return lambda i: (0,) * ndim


def _single_shot(kernel, args, out_shape):
    in_specs = [pl.BlockSpec(a.shape, _zero_index_map(a.ndim)) for a in args]
    out_specs = pl.BlockSpec(out_shape.shape, _zero_index_map(len(out_shape.shape)))
    return pl.pallas_call(
        kernel,
        out_shape=out_shape,
        grid=(1,),
        in_specs=in_specs,
        out_specs=out_specs,
    )(*args)


# ----------------------------------------------------------------------------
# Pallas kernel 1: fused gtnet surrogate chain
#   o = ((relu(relu(x @ Wbig + bbig) @ Wtemp + btemp) @ Wend1 + bend1)) @ Wend2 + bend2
# (start 1x1 conv is pre-folded into the block-diagonal Wbig, so no reshape is needed
#  and the 4 former pallas_linear launches become one kernel.)
# ----------------------------------------------------------------------------
def _gtnet_kernel(x_ref, w0, b0, w1, b1, w2, b2, w3, b3, o_ref):
    h = jnp.dot(x_ref[...], w0[...], preferred_element_type=jnp.float32) + b0[...]
    h = jnp.maximum(
        jnp.dot(h, w1[...], preferred_element_type=jnp.float32) + b1[...], 0.0)
    h = jnp.maximum(
        jnp.dot(h, w2[...], preferred_element_type=jnp.float32) + b2[...], 0.0)
    o_ref[...] = jnp.dot(h, w3[...], preferred_element_type=jnp.float32) + b3[...]


def gtnet_fused(x2, p, T):
    # x2: (B*N, T*C) ; start conv folded: Wbig = kron(I_T, w_start), bbig = tile(b_start)
    w_big = jnp.kron(jnp.eye(T, dtype=jnp.float32), p["w_start"])
    b_big = jnp.tile(p["b_start"], T).reshape(1, -1)
    time_pre = p["w_end2"].shape[1]
    out_shape = jax.ShapeDtypeStruct((x2.shape[0], time_pre), jnp.float32)
    args = [x2, w_big, b_big,
            p["w_temp"], p["b_temp"].reshape(1, -1),
            p["w_end1"], p["b_end1"].reshape(1, -1),
            p["w_end2"], p["b_end2"].reshape(1, -1)]
    return _single_shot(_gtnet_kernel, args, out_shape)       # (B*N, time_pre)


# ----------------------------------------------------------------------------
# Pallas kernel 2: whole GraphSage stack (both graph branches stacked on rows)
#   per layer:  agg = A @ h   (batched over q)
#               h   = relu(h @ W_self + agg @ W_neigh)        (== concat-free form)
# ----------------------------------------------------------------------------
def _sage_kernel(*refs, num_layers):
    x_ref, a_ref = refs[0], refs[1]
    w_refs = refs[2:2 + 2 * num_layers]
    o_ref = refs[-1]

    h = x_ref[...]                                             # (Q, N, F)
    a = a_ref[...]                                             # (N, N)
    q = h.shape[0]
    a_b = jnp.broadcast_to(a[None], (q,) + a.shape)            # (Q, N, N), hoisted

    for l in range(num_layers):
        ws = w_refs[2 * l][...]                                # (F, H)  self weight
        wn = w_refs[2 * l + 1][...]                            # (F, H)  neighbor weight
        agg = jnp.einsum('qnm,qmf->qnf', a_b, h,
                         preferred_element_type=jnp.float32)   # (Q, N, F)
        ws_b = jnp.broadcast_to(ws[None], (q,) + ws.shape)
        wn_b = jnp.broadcast_to(wn[None], (q,) + wn.shape)
        h = jnp.maximum(
            jnp.einsum('qnf,qfh->qnh', h, ws_b, preferred_element_type=jnp.float32)
            + jnp.einsum('qnf,qfh->qnh', agg, wn_b, preferred_element_type=jnp.float32),
            0.0)                                               # (Q, N, H)
    o_ref[...] = h


def graphsage_stack(x_both, a_norm, gs_w):
    # x_both: (Q, N, F0) with both graph branches stacked along Q
    Q, N, _ = x_both.shape
    args = [x_both.astype(jnp.float32), a_norm.astype(jnp.float32)]
    for w in gs_w:
        fin = w.shape[0] // 2
        args.append(w[:fin].astype(jnp.float32))               # W_self  (top half)
        args.append(w[fin:].astype(jnp.float32))               # W_neigh (bottom half)
    out_dim = gs_w[-1].shape[1]
    kern = functools.partial(_sage_kernel, num_layers=len(gs_w))
    out_shape = jax.ShapeDtypeStruct((Q, N, out_dim), jnp.float32)
    return _single_shot(kern, args, out_shape)                 # (Q, N, H)


# ----------------------------------------------------------------------------
# Pallas kernel 3: GRU (TGCNCell surrogate) recurrence over time.
# Packed gates: xg = x @ [wxr|wxu|wxc] + [br|bu|bc],  hg = h @ [whr|whu].
# Hidden state lives in a VMEM scratch; output is written only on the last step.
# Note: torch calls `self.activation(hidden_state)` and discards the result, so no relu.
# ----------------------------------------------------------------------------
def _gru_kernel(x_ref, wx_ref, whru_ref, whc_ref, b_ref, h_out_ref, h_scr, *, d):
    t = pl.program_id(0)

    @pl.when(t == 0)
    def _():
        h_scr[...] = jnp.zeros_like(h_scr)

    x = x_ref[...]                                             # (BN, D)
    h = h_scr[...]                                             # (BN, D)

    xg = jnp.dot(x, wx_ref[...], preferred_element_type=jnp.float32) + b_ref[...]   # (BN, 3D)
    hg = jnp.dot(h, whru_ref[...], preferred_element_type=jnp.float32)              # (BN, 2D)

    r = jax.nn.sigmoid(xg[:, :d] + hg[:, :d])
    u = jax.nn.sigmoid(xg[:, d:2 * d] + hg[:, d:2 * d])
    c = jnp.tanh(xg[:, 2 * d:]
                 + jnp.dot(r * h, whc_ref[...], preferred_element_type=jnp.float32))
    h_new = u * h + (1.0 - u) * c
    h_scr[...] = h_new

    @pl.when(t == pl.num_programs(0) - 1)
    def _():
        h_out_ref[...] = h_new


def gru_over_time(x_seq, p):
    # x_seq: (T, BN, D)
    T, BN, D = x_seq.shape
    wx = jnp.concatenate([p["wxr"], p["wxu"], p["wxc"]], axis=1)        # (D, 3D)
    whru = jnp.concatenate([p["whr"], p["whu"]], axis=1)                # (D, 2D)
    b_all = jnp.concatenate([p["br"], p["bu"], p["bc"]]).reshape(1, 3 * D)
    kern = functools.partial(_gru_kernel, d=D)
    return pl.pallas_call(
        kern,
        out_shape=jax.ShapeDtypeStruct((BN, D), jnp.float32),
        grid=(T,),
        in_specs=[
            pl.BlockSpec((None, BN, D), lambda t: (t, 0, 0)),   # squeezed time dim
            pl.BlockSpec((D, 3 * D), lambda t: (0, 0)),
            pl.BlockSpec((D, 2 * D), lambda t: (0, 0)),
            pl.BlockSpec((D, D), lambda t: (0, 0)),
            pl.BlockSpec((1, 3 * D), lambda t: (0, 0)),
        ],
        out_specs=pl.BlockSpec((BN, D), lambda t: (0, 0)),
        scratch_shapes=[pltpu.VMEM((BN, D), jnp.float32)],
        compiler_params=pltpu.CompilerParams(dimension_semantics=("arbitrary",)),
    )(x_seq.astype(jnp.float32), wx, whru, p["whc"], b_all)


# ----------------------------------------------------------------------------
# Pallas kernel 4: collapsed attention stage.
# W_t = I - 2 n_t n_t^T is orthogonal, hence score = (ht W_t)(ht W_t)^T = ht ht^T for
# every t.  So score and the leaf gate are time-invariant and
#   att_pre[t, i] = sum_j score[i, j] * leaf[j] * grid_x[t, j]
# collapses to one (time_pre, n) x (n, n) matmul.  h_trans is L2-normalized in-kernel.
# ----------------------------------------------------------------------------
def _att_kernel(grid_ref, h_ref, wl_ref, bl_ref, att_ref):
    ht = h_ref[...]                                            # (n, D)
    # F.normalize(p=2, dim=-1, eps=1e-12)
    nrm = jnp.sqrt(jnp.sum(ht * ht, axis=-1, keepdims=True))
    htn = ht / jnp.maximum(nrm, 1e-12)

    score = jax.lax.dot_general(htn, htn, (((1,), (1,)), ((), ())),
                                preferred_element_type=jnp.float32)      # (n, n)

    # leaf gate as a row vector: sigmoid(htn @ w_leaf + b) -> (1, n)
    logits = jax.lax.dot_general(wl_ref[...], htn, (((0,), (1,)), ((), ())),
                                 preferred_element_type=jnp.float32)     # (1, n)
    leaf = jax.nn.sigmoid(logits + bl_ref[...])

    v = grid_ref[...] * leaf                                   # (time_pre, n)
    # att[t, i] = sum_j v[t, j] * score[i, j]
    att_ref[...] = jax.lax.dot_general(v, score, (((1,), (1,)), ((), ())),
                                       preferred_element_type=jnp.float32)


def attention_fused(grid_x, hidden_head, w_leaf, b_leaf):
    time_pre, n = grid_x.shape
    out_shape = jax.ShapeDtypeStruct((time_pre, n), jnp.float32)
    args = [grid_x.astype(jnp.float32), hidden_head.astype(jnp.float32),
            w_leaf.astype(jnp.float32), b_leaf.astype(jnp.float32).reshape(1, 1)]
    return _single_shot(_att_kernel, args, out_shape)          # (time_pre, n)


# ----------------------------------------------------------------------------
# CasTS forward (eval-style: returns att_pre)
# ----------------------------------------------------------------------------
@functools.partial(jax.jit, static_argnames=("cur_node_num",))
def casts_forward(params, x_feature, x_graph, x_graph_inv, cur_node_num):
    B, T, N, C = x_feature.shape

    # --- t_conv (gtnet surrogate), fully fused ---
    # x_feature.transpose(1,3) -> (B,C,N,T); flatten to (B*N, T*C) rows
    x2 = jnp.transpose(x_feature, (0, 2, 1, 3)).reshape(B * N, T * C).astype(jnp.float32)
    grid_all = gtnet_fused(x2, params, T)                      # (B*N, time_pre)
    # grid_x = grid_pred.squeeze(-1).permute(1,0,2).reshape(time_pre,-1)[:, :cur_node_num]
    grid_x = jnp.transpose(grid_all)[:, :cur_node_num]         # (time_pre, n)

    # --- t_gcn (GraphSage) on graph and inverse graph, stacked into one call ---
    F0 = x_graph.shape[-1]
    x_both = jnp.concatenate([x_graph, x_graph_inv], axis=0).reshape(2 * B * T, N, F0)
    sage_out = graphsage_stack(x_both, params["A_norm"], params["gs_w"])   # (2BT, N, H)
    H = sage_out.shape[-1]
    h = sage_out[:B * T].reshape(B, T, N, H)
    h_inv = sage_out[B * T:].reshape(B, T, N, H)
    h_final = jnp.concatenate([h, h_inv], axis=-1)             # (B, T, N, out_dim)
    D = h_final.shape[-1]

    # --- GRU over time_span (Pallas recurrence) ---
    x_seq = jnp.transpose(h_final, (1, 0, 2, 3)).reshape(T, B * N, D)
    hidden = gru_over_time(x_seq, params)                      # (B*N, out_dim)

    # --- collapsed Householder / leaf-gate / attention (Pallas, single call) ---
    att_pre = attention_fused(grid_x, hidden[:cur_node_num],
                              params["w_leaf"], params["b_leaf"])          # (time_pre, n)
    return att_pre


# ----------------------------------------------------------------------------
# Deterministic parameter construction
# ----------------------------------------------------------------------------
def build_params(key, *, input_dim, hidden_dim, out_dim, num_nodes,
                 channel_num, time_train_len, time_predict_len,
                 conv_channels, skip_channels, end_channels):
    ks = iter(jax.random.split(key, 32))
    rnd = lambda shape, s=0.1: (s * jax.random.normal(next(ks), shape)).astype(jnp.float32)

    # fixed normalized chain adjacency for GraphSage
    adj = jnp.eye(num_nodes) + jnp.eye(num_nodes, k=1) + jnp.eye(num_nodes, k=-1)
    a_norm = (adj / jnp.sum(adj, axis=1, keepdims=True)).astype(jnp.float32)

    gs_w = []
    fin = input_dim
    for hdim in hidden_dim:
        gs_w.append(rnd((2 * fin, hdim)))
        fin = hdim

    D = out_dim
    params = {
        "A_norm": a_norm,
        "gs_w": gs_w,
        # gtnet surrogate
        "w_start": rnd((channel_num, conv_channels)), "b_start": rnd((conv_channels,)),
        "w_temp": rnd((time_train_len * conv_channels, skip_channels)), "b_temp": rnd((skip_channels,)),
        "w_end1": rnd((skip_channels, end_channels)), "b_end1": rnd((end_channels,)),
        "w_end2": rnd((end_channels, time_predict_len)), "b_end2": rnd((time_predict_len,)),
        # TGCN GRU cell
        "wxr": rnd((D, D)), "whr": rnd((D, D)), "br": rnd((D,)),
        "wxu": rnd((D, D)), "whu": rnd((D, D)), "bu": rnd((D,)),
        "wxc": rnd((D, D)), "whc": rnd((D, D)), "bc": rnd((D,)),
        # h_list (Householder vectors): only used by the (omitted) training losses —
        # the eval att_pre path is independent of them because W_t is orthogonal.
        "h_list": (jax.random.normal(next(ks), (time_predict_len, D))).astype(jnp.float32),
        # is_leaf_fc
        "w_leaf": rnd((D, 1)), "b_leaf": rnd((1,)),
    }
    return params


if __name__ == "__main__":
    # small, forward-consistent shapes
    B, T, N = 1, 5, 8                 # batch, time_train_len, num_nodes
    C = 1                             # channel_num
    INPUT_DIM = 16                    # node feature dim for GraphSage
    HIDDEN = [16, 16]
    OUT_DIM = HIDDEN[-1] * 2          # is_inv=True
    TIME_PRE = 2                      # time_predict_len
    CUR_NODE_NUM = 8

    key = jax.random.PRNGKey(0)
    k_par, k_xf, k_xg, k_xgi = jax.random.split(key, 4)

    params = build_params(
        k_par, input_dim=INPUT_DIM, hidden_dim=HIDDEN, out_dim=OUT_DIM,
        num_nodes=N, channel_num=C, time_train_len=T, time_predict_len=TIME_PRE,
        conv_channels=32, skip_channels=64, end_channels=128)

    x_feature = jax.random.normal(k_xf, (B, T, N, C), dtype=jnp.float32)
    x_graph = jax.random.normal(k_xg, (B, T, N, INPUT_DIM), dtype=jnp.float32)
    x_graph_inv = jax.random.normal(k_xgi, (B, T, N, INPUT_DIM), dtype=jnp.float32)

    att_pre = casts_forward(params, x_feature, x_graph, x_graph_inv,
                            cur_node_num=CUR_NODE_NUM)
    att_pre = jax.block_until_ready(att_pre)
    assert att_pre.shape == (TIME_PRE, CUR_NODE_NUM)
    assert bool(jnp.all(jnp.isfinite(att_pre)))
    print("KERNEL_OK")
</pallas_src>

<mosaic_0001>
module attributes {stable_mosaic.version = 11 : i64} {
  func.func @_gtnet_kernel(%arg0: i32, %arg1: memref<8x5xf32, #tpu.memory_space<vmem>>, %arg2: memref<5x160xf32, #tpu.memory_space<vmem>>, %arg3: memref<1x160xf32, #tpu.memory_space<vmem>>, %arg4: memref<160x64xf32, #tpu.memory_space<vmem>>, %arg5: memref<1x64xf32, #tpu.memory_space<vmem>>, %arg6: memref<64x128xf32, #tpu.memory_space<vmem>>, %arg7: memref<1x128xf32, #tpu.memory_space<vmem>>, %arg8: memref<128x2xf32, #tpu.memory_space<vmem>>, %arg9: memref<1x2xf32, #tpu.memory_space<vmem>>, %arg10: memref<8x2xf32, #tpu.memory_space<vmem>>) attributes {dimension_semantics = [#tpu.dimension_semantics<arbitrary>], iteration_bounds = array<i64: 1>, scalar_prefetch = 0 : i64, scratch_operands = 0 : i64, tpu.core_type = #tpu.core_type<tc>, window_params = [{pipeline_mode = #tpu.pipeline_mode<synchronous>, transform_indices = @transform_0, window_bounds = array<i64: 8, 5>}, {pipeline_mode = #tpu.pipeline_mode<synchronous>, transform_indices = @transform_1, window_bounds = array<i64: 5, 160>}, {pipeline_mode = #tpu.pipeline_mode<synchronous>, transform_indices = @transform_2, window_bounds = array<i64: 1, 160>}, {pipeline_mode = #tpu.pipeline_mode<synchronous>, transform_indices = @transform_3, window_bounds = array<i64: 160, 64>}, {pipeline_mode = #tpu.pipeline_mode<synchronous>, transform_indices = @transform_4, window_bounds = array<i64: 1, 64>}, {pipeline_mode = #tpu.pipeline_mode<synchronous>, transform_indices = @transform_5, window_bounds = array<i64: 64, 128>}, {pipeline_mode = #tpu.pipeline_mode<synchronous>, transform_indices = @transform_6, window_bounds = array<i64: 1, 128>}, {pipeline_mode = #tpu.pipeline_mode<synchronous>, transform_indices = @transform_7, window_bounds = array<i64: 128, 2>}, {pipeline_mode = #tpu.pipeline_mode<synchronous>, transform_indices = @transform_8, window_bounds = array<i64: 1, 2>}, {pipeline_mode = #tpu.pipeline_mode<synchronous>, transform_indices = @transform_9, window_bounds = array<i64: 8, 2>}]} {
    %c0 = arith.constant 0 : index
    %c0_0 = arith.constant 0 : index
    %0 = vector.load %arg1[%c0, %c0_0] : memref<8x5xf32, #tpu.memory_space<vmem>>, vector<8x5xf32>
    %c0_1 = arith.constant 0 : index
    %c0_2 = arith.constant 0 : index
    %1 = vector.load %arg2[%c0_1, %c0_2] : memref<5x160xf32, #tpu.memory_space<vmem>>, vector<5x160xf32>
    %cst = arith.constant dense<0.000000e+00> : vector<8x160xf32>
    %2 = tpu.matmul %0, %1, %cst {dimension_numbers = #tpu.dot_dimension_numbers<[1], [0], [0], [1], [0, 0, 1, 1], [], []>} : vector<8x5xf32>, vector<5x160xf32>, vector<8x160xf32> -> vector<8x160xf32>
    %c0_3 = arith.constant 0 : index
    %c0_4 = arith.constant 0 : index
    %3 = vector.load %arg3[%c0_3, %c0_4] : memref<1x160xf32, #tpu.memory_space<vmem>>, vector<1x160xf32>
    %4 = vector.broadcast %3 : vector<1x160xf32> to vector<8x160xf32>
    %5 = arith.addf %2, %4 : vector<8x160xf32>
    %c0_5 = arith.constant 0 : index
    %c0_6 = arith.constant 0 : index
    %6 = vector.load %arg4[%c0_5, %c0_6] : memref<160x64xf32, #tpu.memory_space<vmem>>, vector<160x64xf32>
    %cst_7 = arith.constant dense<0.000000e+00> : vector<8x64xf32>
    %7 = tpu.matmul %5, %6, %cst_7 {dimension_numbers = #tpu.dot_dimension_numbers<[1], [0], [0], [1], [0, 0, 1, 1], [], []>} : vector<8x160xf32>, vector<160x64xf32>, vector<8x64xf32> -> vector<8x64xf32>
    %c0_8 = arith.constant 0 : index
    %c0_9 = arith.constant 0 : index
    %8 = vector.load %arg5[%c0_8, %c0_9] : memref<1x64xf32, #tpu.memory_space<vmem>>, vector<1x64xf32>
    %9 = vector.broadcast %8 : vector<1x64xf32> to vector<8x64xf32>
    %10 = arith.addf %7, %9 : vector<8x64xf32>
    %cst_10 = arith.constant 0.000000e+00 : f32
    %11 = vector.broadcast %cst_10 : f32 to vector<8x64xf32>
    %12 = arith.maximumf %10, %11 : vector<8x64xf32>
    %c0_11 = arith.constant 0 : index
    %c0_12 = arith.constant 0 : index
    %13 = vector.load %arg6[%c0_11, %c0_12] : memref<64x128xf32, #tpu.memory_space<vmem>>, vector<64x128xf32>
    %cst_13 = arith.constant dense<0.000000e+00> : vector<8x128xf32>
    %14 = tpu.matmul %12, %13, %cst_13 {dimension_numbers = #tpu.dot_dimension_numbers<[1], [0], [0], [1], [0, 0, 1, 1], [], []>} : vector<8x64xf32>, vector<64x128xf32>, vector<8x128xf32> -> vector<8x128xf32>
    %c0_14 = arith.constant 0 : index
    %c0_15 = arith.constant 0 : index
    %15 = vector.load %arg7[%c0_14, %c0_15] : memref<1x128xf32, #tpu.memory_space<vmem>>, vector<1x128xf32>
    %16 = vector.broadcast %15 : vector<1x128xf32> to vector<8x128xf32>
    %17 = arith.addf %14, %16 : vector<8x128xf32>
    %cst_16 = arith.constant 0.000000e+00 : f32
    %18 = vector.broadcast %cst_16 : f32 to vector<8x128xf32>
    %19 = arith.maximumf %17, %18 : vector<8x128xf32>
    %c0_17 = arith.constant 0 : index
    %c0_18 = arith.constant 0 : index
    %20 = vector.load %arg8[%c0_17, %c0_18] : memref<128x2xf32, #tpu.memory_space<vmem>>, vector<128x2xf32>
    %cst_19 = arith.constant dense<0.000000e+00> : vector<8x2xf32>
    %21 = tpu.matmul %19, %20, %cst_19 {dimension_numbers = #tpu.dot_dimension_numbers<[1], [0], [0], [1], [0, 0, 1, 1], [], []>} : vector<8x128xf32>, vector<128x2xf32>, vector<8x2xf32> -> vector<8x2xf32>
    %c0_20 = arith.constant 0 : index
    %c0_21 = arith.constant 0 : index
    %22 = vector.load %arg9[%c0_20, %c0_21] : memref<1x2xf32, #tpu.memory_space<vmem>>, vector<1x2xf32>
    %23 = vector.broadcast %22 : vector<1x2xf32> to vector<8x2xf32>
    %24 = arith.addf %21, %23 : vector<8x2xf32>
    %c0_22 = arith.constant 0 : index
    %c0_23 = arith.constant 0 : index
    %25 = vector.load %arg10[%c0_22, %c0_23] : memref<8x2xf32, #tpu.memory_space<vmem>>, vector<8x2xf32>
    tpu.vector_store %arg10[%c0_22, %c0_23], %24 {strides = array<i32>} : memref<8x2xf32, #tpu.memory_space<vmem>>, vector<8x2xf32>,
    return
  }
  func.func @transform_0(%arg0: i32) -> (i32, i32) {
    %c0_i32 = arith.constant 0 : i32
    %c0_i32_0 = arith.constant 0 : i32
    %c0_i32_1 = arith.constant 0 : i32
    return %c0_i32, %c0_i32_0 : i32, i32
  }
  func.func @transform_1(%arg0: i32) -> (i32, i32) {
    %c0_i32 = arith.constant 0 : i32
    %c0_i32_0 = arith.constant 0 : i32
    %c0_i32_1 = arith.constant 0 : i32
    return %c0_i32, %c0_i32_0 : i32, i32
  }
  func.func @transform_2(%arg0: i32) -> (i32, i32) {
    %c0_i32 = arith.constant 0 : i32
    %c0_i32_0 = arith.constant 0 : i32
    %c0_i32_1 = arith.constant 0 : i32
    return %c0_i32, %c0_i32_0 : i32, i32
  }
  func.func @transform_3(%arg0: i32) -> (i32, i32) {
    %c0_i32 = arith.constant 0 : i32
    %c0_i32_0 = arith.constant 0 : i32
    %c0_i32_1 = arith.constant 0 : i32
    return %c0_i32, %c0_i32_0 : i32, i32
  }
  func.func @transform_4(%arg0: i32) -> (i32, i32) {
    %c0_i32 = arith.constant 0 : i32
    %c0_i32_0 = arith.constant 0 : i32
    %c0_i32_1 = arith.constant 0 : i32
    return %c0_i32, %c0_i32_0 : i32, i32
  }
  func.func @transform_5(%arg0: i32) -> (i32, i32) {
    %c0_i32 = arith.constant 0 : i32
    %c0_i32_0 = arith.constant 0 : i32
    %c0_i32_1 = arith.constant 0 : i32
    return %c0_i32, %c0_i32_0 : i32, i32
  }
  func.func @transform_6(%arg0: i32) -> (i32, i32) {
    %c0_i32 = arith.constant 0 : i32
    %c0_i32_0 = arith.constant 0 : i32
    %c0_i32_1 = arith.constant 0 : i32
    return %c0_i32, %c0_i32_0 : i32, i32
  }
  func.func @transform_7(%arg0: i32) -> (i32, i32) {
    %c0_i32 = arith.constant 0 : i32
    %c0_i32_0 = arith.constant 0 : i32
    %c0_i32_1 = arith.constant 0 : i32
    return %c0_i32, %c0_i32_0 : i32, i32
  }
  func.func @transform_8(%arg0: i32) -> (i32, i32) {
    %c0_i32 = arith.constant 0 : i32
    %c0_i32_0 = arith.constant 0 : i32
    %c0_i32_1 = arith.constant 0 : i32
    return %c0_i32, %c0_i32_0 : i32, i32
  }
  func.func @transform_9(%arg0: i32) -> (i32, i32) {
    %c0_i32 = arith.constant 0 : i32
    %c0_i32_0 = arith.constant 0 : i32
    %c0_i32_1 = arith.constant 0 : i32
    return %c0_i32, %c0_i32_0 : i32, i32
  }
}

module attributes {stable_mosaic.version = 11 : i64} {
  func.func @_sage_kernel(%arg0: i32, %arg1: memref<10x8x16xf32, #tpu.memory_space<vmem>>, %arg2: memref<8x8xf32, #tpu.memory_space<vmem>>, %arg3: memref<16x16xf32, #tpu.memory_space<vmem>>, %arg4: memref<16x16xf32, #tpu.memory_space<vmem>>, %arg5: memref<16x16xf32, #tpu.memory_space<vmem>>, %arg6: memref<16x16xf32, #tpu.memory_space<vmem>>, %arg7: memref<10x8x16xf32, #tpu.memory_space<vmem>>) attributes {dimension_semantics = [#tpu.dimension_semantics<arbitrary>], iteration_bounds = array<i64: 1>, scalar_prefetch = 0 : i64, scratch_operands = 0 : i64, tpu.core_type = #tpu.core_type<tc>, window_params = [{pipeline_mode = #tpu.pipeline_mode<synchronous>, transform_indices = @transform_0, window_bounds = array<i64: 10, 8, 16>}, {pipeline_mode = #tpu.pipeline_mode<synchronous>, transform_indices = @transform_1, window_bounds = array<i64: 8, 8>}, {pipeline_mode = #tpu.pipeline_mode<synchronous>, transform_indices = @transform_2, window_bounds = array<i64: 16, 16>}, {pipeline_mode = #tpu.pipeline_mode<synchronous>, transform_indices = @transform_3, window_bounds = array<i64: 16, 16>}, {pipeline_mode = #tpu.pipeline_mode<synchronous>, transform_indices = @transform_4, window_bounds = array<i64: 16, 16>}, {pipeline_mode = #tpu.pipeline_mode<synchronous>, transform_indices = @transform_5, window_bounds = array<i64: 16, 16>}, {pipeline_mode = #tpu.pipeline_mode<synchronous>, transform_indices = @transform_6, window_bounds = array<i64: 10, 8, 16>}]} {
    %c0 = arith.constant 0 : index
    %c0_0 = arith.constant 0 : index
    %c0_1 = arith.constant 0 : index
    %0 = vector.load %arg1[%c0, %c0_0, %c0_1] : memref<10x8x16xf32, #tpu.memory_space<vmem>>, vector<10x8x16xf32>
    %c0_2 = arith.constant 0 : index
    %c0_3 = arith.constant 0 : index
    %1 = vector.load %arg2[%c0_2, %c0_3] : memref<8x8xf32, #tpu.memory_space<vmem>>, vector<8x8xf32>
    %2 = vector.shape_cast %1 : vector<8x8xf32> to vector<1x8x8xf32>
    %3 = vector.shape_cast %2 : vector<1x8x8xf32> to vector<1x8x8xf32>
    %4 = vector.broadcast %3 : vector<1x8x8xf32> to vector<10x8x8xf32>
    %c0_4 = arith.constant 0 : index
    %c0_5 = arith.constant 0 : index
    %5 = vector.load %arg3[%c0_4, %c0_5] : memref<16x16xf32, #tpu.memory_space<vmem>>, vector<16x16xf32>
    %c0_6 = arith.constant 0 : index
    %c0_7 = arith.constant 0 : index
    %6 = vector.load %arg4[%c0_6, %c0_7] : memref<16x16xf32, #tpu.memory_space<vmem>>, vector<16x16xf32>
    "tpu.trace_start"() <{level = 10 : i32, message = "qnm,qmf->qnf"}> : () -> ()
    %cst = arith.constant dense<0.000000e+00> : vector<10x8x16xf32>
    %7 = tpu.matmul %4, %0, %cst {dimension_numbers = #tpu.dot_dimension_numbers<[2], [1], [1], [2], [0, 0, 0, 1, 1, 2], [0], [0]>} : vector<10x8x8xf32>, vector<10x8x16xf32>, vector<10x8x16xf32> -> vector<10x8x16xf32>
    "tpu.trace_stop"() : () -> ()
    %8 = vector.shape_cast %5 : vector<16x16xf32> to vector<1x16x16xf32>
    %9 = vector.shape_cast %8 : vector<1x16x16xf32> to vector<1x16x16xf32>
    %10 = vector.broadcast %9 : vector<1x16x16xf32> to vector<10x16x16xf32>
    %11 = vector.shape_cast %6 : vector<16x16xf32> to vector<1x16x16xf32>
    %12 = vector.shape_cast %11 : vector<1x16x16xf32> to vector<1x16x16xf32>
    %13 = vector.broadcast %12 : vector<1x16x16xf32> to vector<10x16x16xf32>
    "tpu.trace_start"() <{level = 10 : i32, message = "qnf,qfh->qnh"}> : () -> ()
    %cst_8 = arith.constant dense<0.000000e+00> : vector<10x8x16xf32>
    %14 = tpu.matmul %0, %10, %cst_8 {dimension_numbers = #tpu.dot_dimension_numbers<[2], [1], [1], [2], [0, 0, 0, 1, 1, 2], [0], [0]>} : vector<10x8x16xf32>, vector<10x16x16xf32>, vector<10x8x16xf32> -> vector<10x8x16xf32>
    %cst_9 = arith.constant dense<0.000000e+00> : vector<10x8x16xf32>
    %15 = tpu.matmul %7, %13, %cst_9 {dimension_numbers = #tpu.dot_dimension_numbers<[2], [1], [1], [2], [0, 0, 0, 1, 1, 2], [0], [0]>} : vector<10x8x16xf32>, vector<10x16x16xf32>, vector<10x8x16xf32> -> vector<10x8x16xf32>
    "tpu.trace_stop"() : () -> ()
    %16 = arith.addf %14, %15 : vector<10x8x16xf32>
    %cst_10 = arith.constant 0.000000e+00 : f32
    %17 = vector.broadcast %cst_10 : f32 to vector<10x8x16xf32>
    %18 = arith.maximumf %16, %17 : vector<10x8x16xf32>
    %c0_11 = arith.constant 0 : index
    %c0_12 = arith.constant 0 : index
    %19 = vector.load %arg5[%c0_11, %c0_12] : memref<16x16xf32, #tpu.memory_space<vmem>>, vector<16x16xf32>
    %c0_13 = arith.constant 0 : index
    %c0_14 = arith.constant 0 : index
    %20 = vector.load %arg6[%c0_13, %c0_14] : memref<16x16xf32, #tpu.memory_space<vmem>>, vector<16x16xf32>
    "tpu.trace_start"() <{level = 10 : i32, message = "qnm,qmf->qnf"}> : () -> ()
    %cst_15 = arith.constant dense<0.000000e+00> : vector<10x8x16xf32>
    %21 = tpu.matmul %4, %18, %cst_15 {dimension_numbers = #tpu.dot_dimension_numbers<[2], [1], [1], [2], [0, 0, 0, 1, 1, 2], [0], [0]>} : vector<10x8x8xf32>, vector<10x8x16xf32>, vector<10x8x16xf32> -> vector<10x8x16xf32>
    "tpu.trace_stop"() : () -> ()
    %22 = vector.shape_cast %19 : vector<16x16xf32> to vector<1x16x16xf32>
    %23 = vector.shape_cast %22 : vector<1x16x16xf32> to vector<1x16x16xf32>
    %24 = vector.broadcast %23 : vector<1x16x16xf32> to vector<10x16x16xf32>
    %25 = vector.shape_cast %20 : vector<16x16xf32> to vector<1x16x16xf32>
    %26 = vector.shape_cast %25 : vector<1x16x16xf32> to vector<1x16x16xf32>
    %27 = vector.broadcast %26 : vector<1x16x16xf32> to vector<10x16x16xf32>
    "tpu.trace_start"() <{level = 10 : i32, message = "qnf,qfh->qnh"}> : () -> ()
    %cst_16 = arith.constant dense<0.000000e+00> : vector<10x8x16xf32>
    %28 = tpu.matmul %18, %24, %cst_16 {dimension_numbers = #tpu.dot_dimension_numbers<[2], [1], [1], [2], [0, 0, 0, 1, 1, 2], [0], [0]>} : vector<10x8x16xf32>, vector<10x16x16xf32>, vector<10x8x16xf32> -> vector<10x8x16xf32>
    %cst_17 = arith.constant dense<0.000000e+00> : vector<10x8x16xf32>
    %29 = tpu.matmul %21, %27, %cst_17 {dimension_numbers = #tpu.dot_dimension_numbers<[2], [1], [1], [2], [0, 0, 0, 1, 1, 2], [0], [0]>} : vector<10x8x16xf32>, vector<10x16x16xf32>, vector<10x8x16xf32> -> vector<10x8x16xf32>
    "tpu.trace_stop"() : () -> ()
    %30 = arith.addf %28, %29 : vector<10x8x16xf32>
    %cst_18 = arith.constant 0.000000e+00 : f32
    %31 = vector.broadcast %cst_18 : f32 to vector<10x8x16xf32>
    %32 = arith.maximumf %30, %31 : vector<10x8x16xf32>
    %c0_19 = arith.constant 0 : index
    %c0_20 = arith.constant 0 : index
    %c0_21 = arith.constant 0 : index
    %33 = vector.load %arg7[%c0_19, %c0_20, %c0_21] : memref<10x8x16xf32, #tpu.memory_space<vmem>>, vector<10x8x16xf32>
    tpu.vector_store %arg7[%c0_19, %c0_20, %c0_21], %32 {strides = array<i32>} : memref<10x8x16xf32, #tpu.memory_space<vmem>>, vector<10x8x16xf32>,
    return
  }
  func.func @transform_0(%arg0: i32) -> (i32, i32, i32) {
    %c0_i32 = arith.constant 0 : i32
    %c0_i32_0 = arith.constant 0 : i32
    %c0_i32_1 = arith.constant 0 : i32
    %c0_i32_2 = arith.constant 0 : i32
    return %c0_i32, %c0_i32_0, %c0_i32_1 : i32, i32, i32
  }
  func.func @transform_1(%arg0: i32) -> (i32, i32) {
    %c0_i32 = arith.constant 0 : i32
    %c0_i32_0 = arith.constant 0 : i32
    %c0_i32_1 = arith.constant 0 : i32
    return %c0_i32, %c0_i32_0 : i32, i32
  }
  func.func @transform_2(%arg0: i32) -> (i32, i32) {
    %c0_i32 = arith.constant 0 : i32
    %c0_i32_0 = arith.constant 0 : i32
    %c0_i32_1 = arith.constant 0 : i32
    return %c0_i32, %c0_i32_0 : i32, i32
  }
  func.func @transform_3(%arg0: i32) -> (i32, i32) {
    %c0_i32 = arith.constant 0 : i32
    %c0_i32_0 = arith.constant 0 : i32
    %c0_i32_1 = arith.constant 0 : i32
    return %c0_i32, %c0_i32_0 : i32, i32
  }
  func.func @transform_4(%arg0: i32) -> (i32, i32) {
    %c0_i32 = arith.constant 0 : i32
    %c0_i32_0 = arith.constant 0 : i32
    %c0_i32_1 = arith.constant 0 : i32
    return %c0_i32, %c0_i32_0 : i32, i32
  }
  func.func @transform_5(%arg0: i32) -> (i32, i32) {
    %c0_i32 = arith.constant 0 : i32
    %c0_i32_0 = arith.constant 0 : i32
    %c0_i32_1 = arith.constant 0 : i32
    return %c0_i32, %c0_i32_0 : i32, i32
  }
  func.func @transform_6(%arg0: i32) -> (i32, i32, i32) {
    %c0_i32 = arith.constant 0 : i32
    %c0_i32_0 = arith.constant 0 : i32
    %c0_i32_1 = arith.constant 0 : i32
    %c0_i32_2 = arith.constant 0 : i32
    return %c0_i32, %c0_i32_0, %c0_i32_1 : i32, i32, i32
  }
}

module attributes {stable_mosaic.version = 11 : i64} {
  func.func @_gru_kernel(%arg0: i32, %arg1: memref<1x8x32xf32, #tpu.memory_space<vmem>>, %arg2: memref<32x96xf32, #tpu.memory_space<vmem>>, %arg3: memref<32x64xf32, #tpu.memory_space<vmem>>, %arg4: memref<32x32xf32, #tpu.memory_space<vmem>>, %arg5: memref<1x96xf32, #tpu.memory_space<vmem>>, %arg6: memref<8x32xf32, #tpu.memory_space<vmem>>, %arg7: memref<8x32xf32, #tpu.memory_space<vmem>>) attributes {dimension_semantics = [#tpu.dimension_semantics<arbitrary>], iteration_bounds = array<i64: 5>, scalar_prefetch = 0 : i64, scratch_operands = 1 : i64, tpu.core_type = #tpu.core_type<tc>, window_params = [{transform_indices = @transform_0, window_bounds = array<i64: 1, 8, 32>}, {pipeline_mode = #tpu.pipeline_mode<synchronous>, transform_indices = @transform_1, window_bounds = array<i64: 32, 96>}, {pipeline_mode = #tpu.pipeline_mode<synchronous>, transform_indices = @transform_2, window_bounds = array<i64: 32, 64>}, {pipeline_mode = #tpu.pipeline_mode<synchronous>, transform_indices = @transform_3, window_bounds = array<i64: 32, 32>}, {pipeline_mode = #tpu.pipeline_mode<synchronous>, transform_indices = @transform_4, window_bounds = array<i64: 1, 96>}, {pipeline_mode = #tpu.pipeline_mode<synchronous>, transform_indices = @transform_5, window_bounds = array<i64: 8, 32>}]} {
    %c0_i32 = arith.constant 0 : i32
    %0 = arith.cmpi eq, %arg0, %c0_i32 : i32
    %1 = arith.extui %0 : i1 to i32
    %c0_i32_0 = arith.constant 0 : i32
    %2 = arith.cmpi ne, %1, %c0_i32_0 : i32
    scf.if %2 {
      %cst_21 = arith.constant 0.000000e+00 : f32
      %44 = vector.broadcast %cst_21 : f32 to vector<8x32xf32>
      %c0_22 = arith.constant 0 : index
      %c0_23 = arith.constant 0 : index
      %45 = vector.load %arg7[%c0_22, %c0_23] : memref<8x32xf32, #tpu.memory_space<vmem>>, vector<8x32xf32>
      tpu.vector_store %arg7[%c0_22, %c0_23], %44 {strides = array<i32>} : memref<8x32xf32, #tpu.memory_space<vmem>>, vector<8x32xf32>,
    } else {
    }
    %c0 = arith.constant 0 : index
    %c0_1 = arith.constant 0 : index
    %c0_2 = arith.constant 0 : index
    %3 = vector.load %arg1[%c0, %c0_1, %c0_2] : memref<1x8x32xf32, #tpu.memory_space<vmem>>, vector<1x8x32xf32>
    %4 = vector.shape_cast %3 : vector<1x8x32xf32> to vector<8x32xf32>
    %c0_3 = arith.constant 0 : index
    %c0_4 = arith.constant 0 : index
    %5 = vector.load %arg7[%c0_3, %c0_4] : memref<8x32xf32, #tpu.memory_space<vmem>>, vector<8x32xf32>
    %c0_5 = arith.constant 0 : index
    %c0_6 = arith.constant 0 : index
    %6 = vector.load %arg2[%c0_5, %c0_6] : memref<32x96xf32, #tpu.memory_space<vmem>>, vector<32x96xf32>
    %cst = arith.constant dense<0.000000e+00> : vector<8x96xf32>
    %7 = tpu.matmul %4, %6, %cst {dimension_numbers = #tpu.dot_dimension_numbers<[1], [0], [0], [1], [0, 0, 1, 1], [], []>} : vector<8x32xf32>, vector<32x96xf32>, vector<8x96xf32> -> vector<8x96xf32>
    %c0_7 = arith.constant 0 : index
    %c0_8 = arith.constant 0 : index
    %8 = vector.load %arg5[%c0_7, %c0_8] : memref<1x96xf32, #tpu.memory_space<vmem>>, vector<1x96xf32>
    %9 = vector.broadcast %8 : vector<1x96xf32> to vector<8x96xf32>
    %10 = arith.addf %7, %9 : vector<8x96xf32>
    %c0_9 = arith.constant 0 : index
    %c0_10 = arith.constant 0 : index
    %11 = vector.load %arg3[%c0_9, %c0_10] : memref<32x64xf32, #tpu.memory_space<vmem>>, vector<32x64xf32>
    %cst_11 = arith.constant dense<0.000000e+00> : vector<8x64xf32>
    %12 = tpu.matmul %5, %11, %cst_11 {dimension_numbers = #tpu.dot_dimension_numbers<[1], [0], [0], [1], [0, 0, 1, 1], [], []>} : vector<8x32xf32>, vector<32x64xf32>, vector<8x64xf32> -> vector<8x64xf32>
    %13 = vector.extract_strided_slice %10 {offsets = [0, 0], sizes = [8, 32], strides = [1, 1]} : vector<8x96xf32> to vector<8x32xf32>
    %14 = vector.extract_strided_slice %12 {offsets = [0, 0], sizes = [8, 32], strides = [1, 1]} : vector<8x64xf32> to vector<8x32xf32>
    %15 = arith.addf %13, %14 : vector<8x32xf32>
    %16 = arith.negf %15 : vector<8x32xf32>
    %17 = math.exp %16 : vector<8x32xf32>
    %cst_12 = arith.constant 1.000000e+00 : f32
    %18 = vector.broadcast %cst_12 : f32 to vector<8x32xf32>
    %19 = arith.addf %18, %17 : vector<8x32xf32>
    %20 = arith.divf %18, %19 : vector<8x32xf32>
    %21 = vector.extract_strided_slice %10 {offsets = [0, 32], sizes = [8, 32], strides = [1, 1]} : vector<8x96xf32> to vector<8x32xf32>
    %22 = vector.extract_strided_slice %12 {offsets = [0, 32], sizes = [8, 32], strides = [1, 1]} : vector<8x64xf32> to vector<8x32xf32>
    %23 = arith.addf %21, %22 : vector<8x32xf32>
    %24 = arith.negf %23 : vector<8x32xf32>
    %25 = math.exp %24 : vector<8x32xf32>
    %cst_13 = arith.constant 1.000000e+00 : f32
    %26 = vector.broadcast %cst_13 : f32 to vector<8x32xf32>
    %27 = arith.addf %26, %25 : vector<8x32xf32>
    %28 = arith.divf %26, %27 : vector<8x32xf32>
    %29 = vector.extract_strided_slice %10 {offsets = [0, 64], sizes = [8, 32], strides = [1, 1]} : vector<8x96xf32> to vector<8x32xf32>
    %30 = arith.mulf %20, %5 : vector<8x32xf32>
    %c0_14 = arith.constant 0 : index
    %c0_15 = arith.constant 0 : index
    %31 = vector.load %arg4[%c0_14, %c0_15] : memref<32x32xf32, #tpu.memory_space<vmem>>, vector<32x32xf32>
    %cst_16 = arith.constant dense<0.000000e+00> : vector<8x32xf32>
    %32 = tpu.matmul %30, %31, %cst_16 {dimension_numbers = #tpu.dot_dimension_numbers<[1], [0], [0], [1], [0, 0, 1, 1], [], []>} : vector<8x32xf32>, vector<32x32xf32>, vector<8x32xf32> -> vector<8x32xf32>
    %33 = arith.addf %29, %32 : vector<8x32xf32>
    %34 = math.tanh %33 : vector<8x32xf32>
    %35 = arith.mulf %28, %5 : vector<8x32xf32>
    %cst_17 = arith.constant 1.000000e+00 : f32
    %36 = vector.broadcast %cst_17 : f32 to vector<8x32xf32>
    %37 = arith.subf %36, %28 : vector<8x32xf32>
    %38 = arith.mulf %37, %34 : vector<8x32xf32>
    %39 = arith.addf %35, %38 : vector<8x32xf32>
    %c0_18 = arith.constant 0 : index
    %c0_19 = arith.constant 0 : index
    %40 = vector.load %arg7[%c0_18, %c0_19] : memref<8x32xf32, #tpu.memory_space<vmem>>, vector<8x32xf32>
    tpu.vector_store %arg7[%c0_18, %c0_19], %39 {strides = array<i32>} : memref<8x32xf32, #tpu.memory_space<vmem>>, vector<8x32xf32>,
    %c4_i32 = arith.constant 4 : i32
    %41 = arith.cmpi eq, %arg0, %c4_i32 : i32
    %42 = arith.extui %41 : i1 to i32
    %c0_i32_20 = arith.constant 0 : i32
    %43 = arith.cmpi ne, %42, %c0_i32_20 : i32
    scf.if %43 {
      %c0_21 = arith.constant 0 : index
      %c0_22 = arith.constant 0 : index
      %44 = vector.load %arg6[%c0_21, %c0_22] : memref<8x32xf32, #tpu.memory_space<vmem>>, vector<8x32xf32>
      tpu.vector_store %arg6[%c0_21, %c0_22], %39 {strides = array<i32>} : memref<8x32xf32, #tpu.memory_space<vmem>>, vector<8x32xf32>,
    } else {
    }
    return
  }
  func.func @transform_0(%arg0: i32) -> (i32, i32, i32) {
    %c0_i32 = arith.constant 0 : i32
    %c0_i32_0 = arith.constant 0 : i32
    %c0_i32_1 = arith.constant 0 : i32
    return %arg0, %c0_i32, %c0_i32_0 : i32, i32, i32
  }
  func.func @transform_1(%arg0: i32) -> (i32, i32) {
    %c0_i32 = arith.constant 0 : i32
    %c0_i32_0 = arith.constant 0 : i32
    %c0_i32_1 = arith.constant 0 : i32
    return %c0_i32, %c0_i32_0 : i32, i32
  }
  func.func @transform_2(%arg0: i32) -> (i32, i32) {
    %c0_i32 = arith.constant 0 : i32
    %c0_i32_0 = arith.constant 0 : i32
    %c0_i32_1 = arith.constant 0 : i32
    return %c0_i32, %c0_i32_0 : i32, i32
  }
  func.func @transform_3(%arg0: i32) -> (i32, i32) {
    %c0_i32 = arith.constant 0 : i32
    %c0_i32_0 = arith.constant 0 : i32
    %c0_i32_1 = arith.constant 0 : i32
    return %c0_i32, %c0_i32_0 : i32, i32
  }
  func.func @transform_4(%arg0: i32) -> (i32, i32) {
    %c0_i32 = arith.constant 0 : i32
    %c0_i32_0 = arith.constant 0 : i32
    %c0_i32_1 = arith.constant 0 : i32
    return %c0_i32, %c0_i32_0 : i32, i32
  }
  func.func @transform_5(%arg0: i32) -> (i32, i32) {
    %c0_i32 = arith.constant 0 : i32
    %c0_i32_0 = arith.constant 0 : i32
    %c0_i32_1 = arith.constant 0 : i32
    return %c0_i32, %c0_i32_0 : i32, i32
  }
}

module attributes {stable_mosaic.version = 11 : i64} {
  func.func @_att_kernel(%arg0: i32, %arg1: memref<2x8xf32, #tpu.memory_space<vmem>>, %arg2: memref<8x32xf32, #tpu.memory_space<vmem>>, %arg3: memref<32x1xf32, #tpu.memory_space<vmem>>, %arg4: memref<1x1xf32, #tpu.memory_space<vmem>>, %arg5: memref<2x8xf32, #tpu.memory_space<vmem>>) attributes {dimension_semantics = [#tpu.dimension_semantics<arbitrary>], iteration_bounds = array<i64: 1>, scalar_prefetch = 0 : i64, scratch_operands = 0 : i64, tpu.core_type = #tpu.core_type<tc>, window_params = [{pipeline_mode = #tpu.pipeline_mode<synchronous>, transform_indices = @transform_0, window_bounds = array<i64: 2, 8>}, {pipeline_mode = #tpu.pipeline_mode<synchronous>, transform_indices = @transform_1, window_bounds = array<i64: 8, 32>}, {pipeline_mode = #tpu.pipeline_mode<synchronous>, transform_indices = @transform_2, window_bounds = array<i64: 32, 1>}, {pipeline_mode = #tpu.pipeline_mode<synchronous>, transform_indices = @transform_3, window_bounds = array<i64: 1, 1>}, {pipeline_mode = #tpu.pipeline_mode<synchronous>, transform_indices = @transform_4, window_bounds = array<i64: 2, 8>}]} {
    %c0 = arith.constant 0 : index
    %c0_0 = arith.constant 0 : index
    %0 = vector.load %arg2[%c0, %c0_0] : memref<8x32xf32, #tpu.memory_space<vmem>>, vector<8x32xf32>
    %1 = arith.mulf %0, %0 : vector<8x32xf32>
    %cst = arith.constant dense<0.000000e+00> : vector<8xf32>
    %2 = vector.multi_reduction <add>, %1, %cst [1] : vector<8x32xf32> to vector<8xf32>
    %3 = vector.shape_cast %2 : vector<8xf32> to vector<8x1xf32>
    %4 = math.sqrt %3 : vector<8x1xf32>
    %cst_1 = arith.constant 9.99999996E-13 : f32
    %5 = vector.broadcast %cst_1 : f32 to vector<8x1xf32>
    %6 = arith.maximumf %4, %5 : vector<8x1xf32>
    %7 = vector.broadcast %6 : vector<8x1xf32> to vector<8x32xf32>
    %8 = arith.divf %0, %7 : vector<8x32xf32>
    %cst_2 = arith.constant dense<0.000000e+00> : vector<8x8xf32>
    %9 = tpu.matmul %8, %8, %cst_2 {dimension_numbers = #tpu.dot_dimension_numbers<[1], [1], [0], [0], [0, 0, 1, 0], [], []>} : vector<8x32xf32>, vector<8x32xf32>, vector<8x8xf32> -> vector<8x8xf32>
    %c0_3 = arith.constant 0 : index
    %c0_4 = arith.constant 0 : index
    %10 = vector.load %arg3[%c0_3, %c0_4] : memref<32x1xf32, #tpu.memory_space<vmem>>, vector<32x1xf32>
    %cst_5 = arith.constant dense<0.000000e+00> : vector<1x8xf32>
    %11 = tpu.matmul %10, %8, %cst_5 {dimension_numbers = #tpu.dot_dimension_numbers<[0], [1], [1], [0], [0, 1, 1, 0], [], []>} : vector<32x1xf32>, vector<8x32xf32>, vector<1x8xf32> -> vector<1x8xf32>
    %c0_6 = arith.constant 0 : index
    %c0_7 = arith.constant 0 : index
    %12 = vector.load %arg4[%c0_6, %c0_7] : memref<1x1xf32, #tpu.memory_space<vmem>>, vector<1x1xf32>
    %13 = vector.broadcast %12 : vector<1x1xf32> to vector<1x8xf32>
    %14 = arith.addf %11, %13 : vector<1x8xf32>
    %15 = arith.negf %14 : vector<1x8xf32>
    %16 = math.exp %15 : vector<1x8xf32>
    %cst_8 = arith.constant 1.000000e+00 : f32
    %17 = vector.broadcast %cst_8 : f32 to vector<1x8xf32>
    %18 = arith.addf %17, %16 : vector<1x8xf32>
    %19 = arith.divf %17, %18 : vector<1x8xf32>
    %c0_9 = arith.constant 0 : index
    %c0_10 = arith.constant 0 : index
    %20 = vector.load %arg1[%c0_9, %c0_10] : memref<2x8xf32, #tpu.memory_space<vmem>>, vector<2x8xf32>
    %21 = vector.broadcast %19 : vector<1x8xf32> to vector<2x8xf32>
    %22 = arith.mulf %20, %21 : vector<2x8xf32>
    %cst_11 = arith.constant dense<0.000000e+00> : vector<2x8xf32>
    %23 = tpu.matmul %22, %9, %cst_11 {dimension_numbers = #tpu.dot_dimension_numbers<[1], [1], [0], [0], [0, 0, 1, 0], [], []>} : vector<2x8xf32>, vector<8x8xf32>, vector<2x8xf32> -> vector<2x8xf32>
    %c0_12 = arith.constant 0 : index
    %c0_13 = arith.constant 0 : index
    %24 = vector.load %arg5[%c0_12, %c0_13] : memref<2x8xf32, #tpu.memory_space<vmem>>, vector<2x8xf32>
    tpu.vector_store %arg5[%c0_12, %c0_13], %23 {strides = array<i32>} : memref<2x8xf32, #tpu.memory_space<vmem>>, vector<2x8xf32>,
    return
  }
  func.func @transform_0(%arg0: i32) -> (i32, i32) {
    %c0_i32 = arith.constant 0 : i32
    %c0_i32_0 = arith.constant 0 : i32
    %c0_i32_1 = arith.constant 0 : i32
    return %c0_i32, %c0_i32_0 : i32, i32
  }
  func.func @transform_1(%arg0: i32) -> (i32, i32) {
    %c0_i32 = arith.constant 0 : i32
    %c0_i32_0 = arith.constant 0 : i32
    %c0_i32_1 = arith.constant 0 : i32
    return %c0_i32, %c0_i32_0 : i32, i32
  }
  func.func @transform_2(%arg0: i32) -> (i32, i32) {
    %c0_i32 = arith.constant 0 : i32
    %c0_i32_0 = arith.constant 0 : i32
    %c0_i32_1 = arith.constant 0 : i32
    return %c0_i32, %c0_i32_0 : i32, i32
  }
  func.func @transform_3(%arg0: i32) -> (i32, i32) {
    %c0_i32 = arith.constant 0 : i32
    %c0_i32_0 = arith.constant 0 : i32
    %c0_i32_1 = arith.constant 0 : i32
    return %c0_i32, %c0_i32_0 : i32, i32
  }
  func.func @transform_4(%arg0: i32) -> (i32, i32) {
    %c0_i32 = arith.constant 0 : i32
    %c0_i32_0 = arith.constant 0 : i32
    %c0_i32_1 = arith.constant 0 : i32
    return %c0_i32, %c0_i32_0 : i32, i32
  }
}

</mosaic_0001>

<bundles_post_ra>
// kernel: tile.9
= control target key start
LH: loop header
LB: loop body
LE: loop exit
PB: predicated region body
PF: predicated region fallthrough
CT: control target
= control target key end

     0   :  { %s42_s8 = smov 96   ;;  %s2_s11 = smov 3  ;;  %vm4_vm0 = vcmask 261120   ;;  %vm10_vm1 = vcmask 1048320   ;;  %vm16_vm2 = vcmask 785920   ;;  %vm22_vm3 = vcmask 523520   ;;  %s73_s0 = inlined_call_operand.vmem [shape: f32[5,32], index: 0, kind: input, shape index: {}]   ;;  %s74_s1 = inlined_call_operand.vmem [shape: f32[1,160], index: 1, kind: output, shape index: {}]  }
   0x1   :  { %v35_v0 = vld [vmem:[%s73_s0 + $0x3] sm:$0x1]   ;;  %v37_v1 = vld [vmem:[%s73_s0 + $0x1] sm:$0x1]   ;;  %v36_v2 = vld [vmem:[%s73_s0 + $0x2] sm:$0x1]  }
   0x2   :  { %8 = vrot.lane.b32.xlu0 %v35_v0, %s42_s8  ;;  %s43_s14 = smov 32   ;;  %v3_v3 = vld [vmem:[%s73_s0] ss:$4 sm:%s2_s11]   ;;  %s44_s0 = smov 64  }
   0x3   :  { %20 = vrot.lane.b32.xlu1 %v37_v1, %s43_s14  ;;  %5 = vst.msk [vmem:[#allocation0] ss:$8 sm:$0x3] %vm4_vm0, %v3_v3  }
   0x6   :  { %14 = vrot.lane.b32.xlu0 %v36_v2, %s44_s0 }
   0xa   :  { %v31_v4 = vld [vmem:[#allocation0 + $0x8] sm:$0x1] }
   0xb   :  { %38 = vst [vmem:[%s74_s1 + $0x1] sm:$0x1] %v31_v4 }
  0x74   :  { %v9_v5 = vpop.permute.xlu0 %8  }
  0x75   :  { %11 = vst.msk [vmem:[#allocation0] sm:$0x1] %vm10_vm1, %v9_v5   ;;  %v21_v6 = vpop.permute.xlu1 %20  }
  0x78   :  { %v15_v7 = vpop.permute.xlu0 %14  }
  0x79   :  { %17 = vst.msk [vmem:[#allocation0] sm:$0x1] %vm16_vm2, %v15_v7  }
  0x7a   :  { %23 = vst.msk [vmem:[#allocation0] sm:$0x1] %vm22_vm3, %v21_v6  }
  0x81   :  { %v27_v8 = vld [vmem:[#allocation0] sm:$0x1] }
  0x82   :  { %29 = vst [vmem:[%s74_s1] sm:$0x1] %v27_v8 }

// kernel: casts_forward.4
= control target key start
LH: loop header
LB: loop body
LE: loop exit
PB: predicated region body
PF: predicated region fallthrough
CT: control target
= control target key end

     0   :  { %vm51_vm0 = vcmask 1044480   ;;  %v577_v2 = vmov 0.0   ;;  %vm47_vm1 = vcmask 39936   ;;  %v578_v4 = vmov 0.0|0.0   ;;  %s813_s1 = inlined_call_operand.vmem [shape: f32[5,160], index: 1, kind: input, shape index: {}]   ;;  %s814_s0 = inlined_call_operand.vmem [shape: f32[8,5], index: 0, kind: input, shape index: {}]   ;;  %s815_s3 = inlined_call_operand.vmem [shape: f32[160,64], index: 3, kind: input, shape index: {}]   ;;  %s816_s5 = inlined_call_operand.vmem [shape: f32[64,128], index: 5, kind: input, shape index: {}]   ;;  %s817_s2 = inlined_call_operand.vmem [shape: f32[1,160], index: 2, kind: input, shape index: {}]   ;;  %s818_s4 = inlined_call_operand.vmem [shape: f32[1,64], index: 4, kind: input, shape index: {}]   ;;  %s819_s7 = inlined_call_operand.vmem [shape: f32[128,2], index: 7, kind: input, shape index: {}]   ;;  %s820_s6 = inlined_call_operand.vmem [shape: f32[1,128], index: 6, kind: input, shape index: {}]   ;;  %s821_s8 = inlined_call_operand.vmem [shape: f32[1,2], index: 8, kind: input, shape index: {}]   ;;  %s822_s9 = inlined_call_operand.vmem [shape: f32[8,2], index: 9, kind: output, shape index: {}]  }
   0x1   :  { %v34_v0 = vld [vmem:[%s813_s1 + $0x8] sm:$0x1f]  ;;  %v33_v1 = vld [vmem:[%s813_s1] sm:$0x1f]  ;;  %122 = vmatprep.mubr.f32.mxu1 %v577_v2  ;;  %538 = vmatprep.subr.bf16.mxu0 %v578_v4  ;;  %v131_v7 = vld [vmem:[%s815_s3 + $0x10] sm:$0xff]  ;;  %v37_v44 = vlaneseq  ;;  %vm156_vm2 = vcmask 261120  }
   0x2   :  { %v32_v3 = vld [vmem:[%s814_s0] sm:$0xff]  ;;  %420 = vmatprep.subr.msk.mxu1 %vm51_vm0, %v34_v0  ;;  %v130_v6 = vld [vmem:[%s815_s3 + $0x8] sm:$0xff]  ;;  %v132_v9 = vld [vmem:[%s815_s3 + $0x18] sm:$0xff]  ;;  %vm579_vm3 = vmmov 0   ;;  %vm246_vm4 = vcmask 523264   ;;  %vm414_vm5 = vcmask 15360  }
   0x3   :  { %v129_v5 = vld [vmem:[%s815_s3] sm:$0xff]  ;;  %421 = vmatpush1.msk.msra.mxu1 %vm51_vm0, %v33_v1  ;;  %v512_v10 = vpack.c.bf16 %v132_v9, %v131_v7  ;;  %v134_v12 = vld [vmem:[%s815_s3 + $0x28] sm:$0xff]  ;;  %v135_v14 = vld [vmem:[%s815_s3 + $0x30] sm:$0xff]  ;;  %v38_v45 = vshrl.u32 %v37_v44, 7  ;;  %470 = vmatprep.mubr.msk.f32.mxu0 %vm579_vm3, %v577_v2 }
   0x4   :  { %v509_v8 = vpack.c.bf16 %v130_v6, %v129_v5  ;;  %422 = vmatmul.mubr.msk.f32.vlgmr.msra.gmra.mrb[0].mxu1 %vm47_vm1, %v32_v3  ;;  %508 = vmatprep.subr.bf16.mxu1 %v578_v4  ;;  %v133_v11 = vld [vmem:[%s815_s3 + $0x20] sm:$0xff]  ;;  %v136_v15 = vld [vmem:[%s815_s3 + $0x38] sm:$0xff]  ;;  %v138_v18 = vld [vmem:[%s815_s3 + $0x48] sm:$0xff] }
   0x5   :  { %v515_v13 = vpack.c.bf16 %v134_v12, %v133_v11  ;;  %v518_v16 = vpack.c.bf16 %v136_v15, %v135_v14  ;;  %v137_v17 = vld [vmem:[%s815_s3 + $0x40] sm:$0xff]  ;;  %v139_v20 = vld [vmem:[%s815_s3 + $0x50] sm:$0xff]  ;;  %v140_v21 = vld [vmem:[%s815_s3 + $0x58] sm:$0xff]  ;;  %v43_v46 = vsub.s32 1, %v38_v45  ;;  %v39_v48 = vsub.s32 0, %v38_v45 }
   0x6   :  { %510 = vmatpush1.bf16.msra.mxu1 %v509_v8  ;;  %v521_v19 = vpack.c.bf16 %v138_v18, %v137_v17  ;;  %v524_v22 = vpack.c.bf16 %v140_v21, %v139_v20  ;;  %v141_v23 = vld [vmem:[%s815_s3 + $0x60] sm:$0xff]  ;;  %v142_v24 = vld [vmem:[%s815_s3 + $0x68] sm:$0xff]  ;;  %v143_v26 = vld [vmem:[%s815_s3 + $0x70] sm:$0xff] }
   0x7   :  { %511 = vmatprep.subr.bf16.mxu1 %v578_v4  ;;  %v527_v25 = vpack.c.bf16 %v142_v24, %v141_v23  ;;  %v144_v27 = vld [vmem:[%s815_s3 + $0x78] sm:$0xff]  ;;  %v145_v29 = vld [vmem:[%s815_s3 + $0x80] sm:$0xff]  ;;  %v146_v30 = vld [vmem:[%s815_s3 + $0x88] sm:$0xff] }
   0x8   :  { %v530_v28 = vpack.c.bf16 %v144_v27, %v143_v26  ;;  %v533_v31 = vpack.c.bf16 %v146_v30, %v145_v29  ;;  %v147_v32 = vld [vmem:[%s815_s3 + $0x90] sm:$0xff]  ;;  %v148_v33 = vld [vmem:[%s815_s3 + $0x98] sm:$0xff]  ;;  %v231_v35 = vld [vmem:[%s816_s5] sm:$0xff] }
   0x9   :  { %v536_v34 = vpack.c.bf16 %v148_v33, %v147_v32  ;;  %v232_v36 = vld [vmem:[%s816_s5 + $0x8] sm:$0xff]  ;;  %v233_v37 = vld [vmem:[%s816_s5 + $0x10] sm:$0xff]  ;;  %v234_v39 = vld [vmem:[%s816_s5 + $0x18] sm:$0xff] }
   0xa   :  { %513 = vmatpush1.bf16.msra.mxu1 %v512_v10  ;;  %v539_v38 = vpack.c.bf16 %v232_v36, %v231_v35  ;;  %v542_v40 = vpack.c.bf16 %v234_v39, %v233_v37  ;;  %v235_v41 = vld [vmem:[%s816_s5 + $0x20] sm:$0xff]  ;;  %v236_v42 = vld [vmem:[%s816_s5 + $0x28] sm:$0xff]  ;;  %v237_v55 = vld [vmem:[%s816_s5 + $0x30] sm:$0xff] }
   0xb   :  { %514 = vmatprep.subr.bf16.mxu1 %v578_v4  ;;  %v545_v43 = vpack.c.bf16 %v236_v42, %v235_v41  ;;  %v35_v47 = vld [vmem:[%s817_s2] sm:$0x3]  ;;  %v238_v56 = vld [vmem:[%s816_s5 + $0x38] sm:$0xff]  ;;  %v322_v60 = vld [vmem:[%s819_s7 + $0x8] sm:$0xff] }
   0xc   :  { %540 = vmatpush3.bf16.msra.mxu0 %v539_v38  ;;  %v44_v49 = vrot.slane %v35_v47, %v43_v46  ;;  %v40_v50 = vrot.slane %v35_v47, %v39_v48  ;;  %v548_v57 = vpack.c.bf16 %v238_v56, %v237_v55  ;;  %v423_v58 = vld [vmem:[%s818_s4] ss:$0 sm:$0xff]  ;;  %v323_v3 = vld [vmem:[%s819_s7 + $0x10] sm:$0xff]  ;;  %v324_v5 = vld [vmem:[%s819_s7 + $0x18] sm:$0xff] }
   0xd   :  { %541 = vmatprep.subr.bf16.mxu0 %v578_v4  ;;  %v321_v59 = vld [vmem:[%s819_s7] sm:$0xff]  ;;  %v554_v6 = vpack.c.bf16 %v324_v5, %v323_v3  ;;  %v326_v8 = vld [vmem:[%s819_s7 + $0x28] sm:$0xff]  ;;  %v327_v10 = vld [vmem:[%s819_s7 + $0x30] sm:$0xff] }
   0xe   :  { %516 = vmatpush1.bf16.msra.mxu1 %v515_v13  ;;  %v551_v0 = vpack.c.bf16 %v322_v60, %v321_v59  ;;  %v325_v7 = vld [vmem:[%s819_s7 + $0x20] sm:$0xff]  ;;  %v330_v13 = vld [vmem:[%s819_s7 + $0x48] sm:$0xff]  ;;  %v331_v15 = vld [vmem:[%s819_s7 + $0x50] sm:$0xff] }
   0xf   :  { %517 = vmatprep.subr.bf16.mxu1 %v578_v4  ;;  %v557_v9 = vpack.c.bf16 %v326_v8, %v325_v7  ;;  %v329_v12 = vld [vmem:[%s819_s7 + $0x40] sm:$0xff]  ;;  %v335_v21 = vld [vmem:[%s819_s7 + $0x70] sm:$0xff] }
  0x10   :  { %543 = vmatpush3.bf16.msra.mxu0 %v542_v40  ;;  %v563_v14 = vpack.c.bf16 %v330_v13, %v329_v12  ;;  %v333_v18 = vld [vmem:[%s819_s7 + $0x60] sm:$0xff] }
  0x11   :  { %544 = vmatprep.subr.bf16.mxu0 %v578_v4  ;;  %v425_v24 = vld [vmem:[%s820_s6] ss:$0 sm:$0xff] }
  0x12   :  { %519 = vmatpush1.bf16.msra.mxu1 %v518_v16  ;;  %v332_v16 = vld [vmem:[%s819_s7 + $0x58] sm:$0xff] }
  0x13   :  { %520 = vmatprep.subr.bf16.mxu1 %v578_v4  ;;  %v566_v17 = vpack.c.bf16 %v332_v16, %v331_v15 }
  0x14   :  { %546 = vmatpush3.bf16.msra.mxu0 %v545_v43 }
  0x15   :  { %547 = vmatprep.subr.bf16.mxu0 %v578_v4 }
  0x16   :  { %522 = vmatpush1.bf16.msra.mxu1 %v521_v19  ;;  %v334_v19 = vld [vmem:[%s819_s7 + $0x68] sm:$0xff] }
  0x17   :  { %523 = vmatprep.subr.bf16.mxu1 %v578_v4  ;;  %v569_v20 = vpack.c.bf16 %v334_v19, %v333_v18 }
  0x18   :  { %549 = vmatpush3.bf16.msra.mxu0 %v548_v57 }
  0x19   :  { %550 = vmatprep.subr.bf16.mxu0 %v578_v4 }
  0x1a   :  { %525 = vmatpush1.bf16.msra.mxu1 %v524_v22  ;;  %v336_v22 = vld [vmem:[%s819_s7 + $0x78] sm:$0xff] }
  0x1b   :  { %526 = vmatprep.subr.bf16.mxu1 %v578_v4  ;;  %v572_v23 = vpack.c.bf16 %v336_v22, %v335_v21 }
  0x1e   :  { %528 = vmatpush1.bf16.msra.mxu1 %v527_v25 }
  0x1f   :  { %529 = vmatprep.subr.bf16.mxu1 %v578_v4 }
  0x22   :  { %531 = vmatpush1.bf16.msra.mxu1 %v530_v28 }
  0x23   :  { %532 = vmatprep.subr.bf16.mxu1 %v578_v4 }
  0x26   :  { %534 = vmatpush1.bf16.msra.mxu1 %v533_v31 }
  0x27   :  { %535 = vmatprep.subr.bf16.mxu1 %v578_v4 }
  0x2a   :  { %537 = vmatpush1.bf16.msra.mxu1 %v536_v34 }
  0xd7   :  { %v124_v51 = vpop.f32.mrb[0].mxu1 }
  0xd8   :  { %v126_v52 = vpop.f32.mrb[1].mxu1  ;;  %v125_v54 = vadd.f32 %v124_v51, %v40_v50 }
  0xd9   :  { %v127_v53 = vadd.f32 %v126_v52, %v44_v49 }
  0xdb   :  { %424 = vmatprep.mubr.msk.f32.mxu1 %vm156_vm2, %v127_v53 }
  0xdc   :  { %225 = vmatmul.mubr.f32.vlgmr.msra.gmra.mrb[2].mxu1 %v125_v54 }
 0x1af   :  { %v226_v61 = vpop.f32.mrb[2].mxu1 }
 0x1b0   :  { %v227_v62 = vadd.f32 %v423_v58, %v226_v61  ;;  %v228_v63 = vpop.f32.mrb[3].mxu1 }
 0x1b2   :  { %v230_v1 = vmax.f32 %v227_v62, 0.0 }
 0x1b4   :  { %471 = vmatmul.mubr.msk.f32.vlgmr.msra.gmra.mrb[0].mxu0 %vm246_vm4, %v230_v1 }
 0x1b5   :  { %552 = vmatpush3.bf16.msra.mxu0 %v551_v0  ;;  %505 = vmatprep.mubr.msk.f32.mxu0 %vm579_vm3, %v577_v2  ;;  %v328_v2 = vld [vmem:[%s819_s7 + $0x38] sm:$0xff] }
 0x1b6   :  { %553 = vmatprep.subr.bf16.mxu0 %v578_v4  ;;  %v560_v11 = vpack.c.bf16 %v328_v2, %v327_v10 }
 0x1b9   :  { %555 = vmatpush3.bf16.msra.mxu0 %v554_v6 }
 0x1ba   :  { %556 = vmatprep.subr.bf16.mxu0 %v578_v4 }
 0x1bd   :  { %558 = vmatpush3.bf16.msra.mxu0 %v557_v9 }
 0x1be   :  { %559 = vmatprep.subr.bf16.mxu0 %v578_v4 }
 0x1c1   :  { %561 = vmatpush3.bf16.msra.mxu0 %v560_v11 }
 0x1c2   :  { %562 = vmatprep.subr.bf16.mxu0 %v578_v4 }
 0x1c5   :  { %564 = vmatpush3.bf16.msra.mxu0 %v563_v14 }
 0x1c6   :  { %565 = vmatprep.subr.bf16.mxu0 %v578_v4 }
 0x1c9   :  { %567 = vmatpush3.bf16.msra.mxu0 %v566_v17 }
 0x1ca   :  { %568 = vmatprep.subr.bf16.mxu0 %v578_v4 }
 0x1cd   :  { %570 = vmatpush3.bf16.msra.mxu0 %v569_v20 }
 0x1ce   :  { %571 = vmatprep.subr.bf16.mxu0 %v578_v4  ;;  %v427_v4 = vld [vmem:[%s821_s8] ss:$0 sm:$0xff] }
 0x1d1   :  { %573 = vmatpush3.bf16.msra.mxu0 %v572_v23 }
 0x287   :  { %v316_v25 = vpop.f32.mrb[0].mxu0 }
 0x288   :  { %v317_v26 = vadd.f32 %v425_v24, %v316_v25  ;;  %v472_v27 = vpop.f32.mrb[1].mxu0 }
 0x28a   :  { %v320_v28 = vmax.f32 %v317_v26, 0.0 }
 0x28c   :  { %506 = vmatmul.mubr.f32.vlgmr.msra.gmra.mrb[2].mxu0 %v320_v28 }
 0x35f   :  { %v410_v29 = vpop.f32.mrb[2].mxu0 }
 0x360   :  { %v411_v30 = vadd.f32 %v427_v4, %v410_v29  ;;  %v507_v31 = vpop.f32.mrb[3].mxu0 }
 0x362   :  { %415 = vst.msk [vmem:[%s822_s9] sm:$0xff] %vm414_vm5, %v411_v30 }

// kernel: casts_forward.7
= control target key start
LH: loop header
LB: loop body
LE: loop exit
PB: predicated region body
PF: predicated region fallthrough
CT: control target
= control target key end

     0   :  { %s471_s0 = inlined_call_operand.vmem [shape: f32[2,8], index: 0, kind: input, shape index: {}]   ;;  %s472_s1 = inlined_call_operand.vmem [shape: f32[8,32], index: 1, kind: input, shape index: {}]   ;;  %s473_s2 = inlined_call_operand.vmem [shape: f32[32,1], index: 2, kind: input, shape index: {}]   ;;  %s474_s3 = inlined_call_operand.<no memory space> [shape: f32[1,1], index: 3, kind: input, shape index: {}]   ;;  %s475_s4 = inlined_call_operand.hbm [shape: f32[2,8], index: 4, kind: output, shape index: {}]  }
   0x1   :  { %v9_v0 = vstv %s474_s3 }
   0x2   :  { %10 = vst [vmem:[#allocation2] sm:$0x1] %v9_v0 }
   0x3   :  { %v20_v1 = vld [vmem:[%s472_s1] sm:$0xff]  ;;  %vm22_vm0 = vcmask 261120  }
   0x4   :  { %v21_v2 = vmul.f32 %v20_v1, %v20_v1 }
   0x5   :  { %11 = vsyncpa [#allocation4], 0  ;;  %v399_v4 = vmov 0.0   ;;  %v109_v5 = vld [vmem:[%s473_s2] sm:$0xff]  ;;  %vm400_vm1 = vmmov 0   ;;  %v110_v6 = vld [vmem:[%s473_s2 + $0x8] sm:$0xff]  ;;  %v119_v21 = vlaneseq }
   0x6   :  { %v23_v3 = vsel %vm22_vm0, %v21_v2, 0.0  ;;  %346 = vmatprep.subr.mxu0 %v399_v4  ;;  %351 = vmatprep.subr.mxu1 %v399_v4  ;;  %v401_v8 = vmov 0   ;;  %v111_v9 = vld [vmem:[%s473_s2 + $0x10] sm:$0xff]  ;;  %v112_v10 = vld [vmem:[%s473_s2 + $0x18] sm:$0xff]  ;;  %vm240_vm4 = vcmask 64512   ;;  %s402_s26 = smov [#allocation3]  }
   0x7   :  { %24 = vadd.xlane.f32.xlu0 %v23_v3  ;;  %348 = vmatprep.mubr.msk.f32.mxu0 %vm400_vm1, %v399_v4  ;;  %v120_v22 = vshrl.u32 %v119_v21, 7  ;;  %v234_v35 = vld [vmem:[%s471_s0] sm:$0x3]  ;;  %s325_s27 = sshll.u32 %s402_s26, 4  ;;  %vm317_vm5 = vcmask 58368   ;;  %s326_s27 = int_to_ptr.vmem [resolvable:$true] %s325_s27 }
   0x8   :  { %353 = vmatprep.mubr.msk.f32.mxu1 %vm400_vm1, %v399_v4  ;;  %365 = vset.pattern.permute.xlu1 %v401_v8  ;;  %s375_s28 = scalar_lea.vmem %s326_s27, 32  ;;  %p380_p1 = scmp.lt.s32.totalorder %s326_s27, %s326_s27 }
   0x9   :  { %v113_v7 = vld [vmem:[#allocation2] sm:$0x1]  ;;  %v121_v23 = vsub.s32 0, %v120_v22  ;;  %p376_p0 = scmp.ne.s32.totalorder %s326_s27, %s375_s28  ;;  %p381_p2 = scmp.lt.s32.totalorder %s375_s28, %s375_s28 }
   0xa   :  { %116 = vperm.xlu1 %365, %v113_v7  }
   0xb   :  { %p382_p3 = por %p381_p2, %p380_p1 }
   0xd   :  { %p383_p4 = pnand %p382_p3, %p376_p0 }
  0x34   :  { %123 = vxpose.xlu0.b32.start [1/4] (short) (narrow) %v109_v5, 8 }
  0x38   :  { %124 = vxpose.xlu0.b32.cont [2/4] (short) (narrow) %v110_v6, 8 }
  0x3c   :  { %125 = vxpose.xlu0.b32.cont [3/4] (short) (narrow) %v111_v9, 8 }
  0x40   :  { %126 = vxpose.xlu0.b32.end [4/4] (short) (narrow) %v112_v10, 8 }
  0x69   :  { %366 = vset.pattern.permute.xlu0 %v401_v8 }
  0x89   :  { %v117_v24 = vpop.permute.xlu1 %116 }
  0x8a   :  { %v122_v25 = vrot.slane %v117_v24, %v121_v23 }
  0x94   :  { %v25_v11 = vpop.xlane.xlu0 %24 }
  0x95   :  { %367 = vrsqrt.f32 %v25_v11  ;;  %vm28_vm2 = vcmp.eq.f32.partialorder %v25_v11, inf  ;;  %v31_v14 = vand.u32 2147483648, %v25_v11  ;;  %vm30_vm3 = vcmp.eq.f32.partialorder %v25_v11, 0.0 }
  0x9f   :  { %v368_v12 = vpop.eup %367 }
  0xa0   :  { %v27_v13 = vmul.f32 %v368_v12, %v25_v11 }
  0xa2   :  { %v29_v15 = vsel %vm28_vm2, %v25_v11, %v27_v13 }
  0xa3   :  { %v32_v16 = vsel %vm30_vm3, %v31_v14, %v29_v15 }
  0xa4   :  { %v33_v17 = vmax.f32 %v32_v16, 1e-12 }
  0xa6   :  { %369 = vrcp.f32 %v33_v17 }
  0xb0   :  { %v370_v18 = vpop.eup %369 }
  0xb1   :  { %v35_v19 = vmul.f32 %v370_v18, %v20_v1 }
  0xb3   :  { %347 = vmatpush3.xpose.msk.msra.mxu0 %vm22_vm0, %v35_v19  ;;  %352 = vmatpush3.xpose.msk.msra.mxu1 %vm22_vm0, %v35_v19 }
  0xb4   :  { %v139_v20 = vpop.trf.xlu0  ;;  %356 = vmatprep.subr.mxu0 %v399_v4 }
  0xb6   :  { %349 = vmatmul.mubr.msk.f32.vlgmr.msra.gmra.mrb[0].mxu0 %vm22_vm0, %v35_v19  ;;  %354 = vmatmul.mubr.msk.f32.vlgmr.msra.gmra.mrb[0].mxu1 %vm22_vm0, %v139_v20 }
  0xb7   :  { %358 = vmatprep.mubr.msk.f32.mxu0 %vm400_vm1, %v399_v4 }
 0x189   :  { %v105_v26 = vpop.f32.mrb[0].mxu0  ;;  %v224_v27 = vpop.f32.mrb[0].mxu1 }
 0x18a   :  { %v225_v28 = vadd.f32 %v224_v27, %v122_v25  ;;  %v350_v29 = vpop.f32.mrb[1].mxu0  ;;  %v355_v30 = vpop.f32.mrb[1].mxu1  ;;  %357 = vmatpush3.xpose.msk.msra.mxu0 %vm240_vm4, %v105_v26 }
 0x18c   :  { %v337_v31 = vmul.f32 -1.442695, %v225_v28 }
 0x18e   :  { %371 = vpow2.f32 %v337_v31 }
 0x198   :  { %v372_v32 = vpop.eup %371 }
 0x199   :  { %v231_v33 = vadd.f32 1.0, %v372_v32 }
 0x19b   :  { %373 = vrcp.f32 %v231_v33 }
 0x1a5   :  { %v374_v34 = vpop.eup %373 }
 0x1a6   :  { %v238_v36 = vrot.slane %v374_v34, %v121_v23 }
 0x1a8   :  { %v239_v37 = vmul.f32 %v238_v36, %v234_v35 }
 0x1aa   :  { %359 = vmatmul.mubr.msk.f32.vlgmr.msra.gmra.mrb[2].mxu0 %vm240_vm4, %v239_v37 }
 0x27d   :  { %v313_v38 = vpop.f32.mrb[2].mxu0 }
 0x27e   :  { %318 = vst.msk [vmem:[#allocation3] sm:$0x3] %vm317_vm5, %v313_v38  ;;  %v360_v39 = vpop.f32.mrb[3].mxu0 }
 0x27f   :  { %386 = shalt.err (!%p383_p4)
}
 0x280   :  { %s387_s30 = scalar_lea.hbm %s475_s4, 32 }
 0x281   :  { %p388_p5 = scmp.ne.s32.totalorder %s475_s4, %s387_s30  ;;  %p391_p6 = scmp.lt.u32.totalorder %s387_s30, %s475_s4 }
 0x283   :  { %p393_p7 = pnand %p391_p6, %p388_p5 }
 0x285   :  { %396 = shalt.err (!%p393_p7)
}
 0x286   :  { %328 = dma.vmem_to_hbm [thread:$0]  %s326_s27, 32, %s475_s4, [#allocation4]  }
 0x287   :  { %397 = dma.done.wait [#allocation4], 32  }
 0x288   :  { %398 = vsyncadd [#allocation4], 4294967264 }
 0x289   :  { %332 = vsyncpa [#allocation4], 1 }

// kernel: casts_forward.6
= control target key start
LH: loop header
LB: loop body
LE: loop exit
PB: predicated region body
PF: predicated region fallthrough
CT: control target
= control target key end

     0   :  { %s663_s18 = smov 0   ;;  %s736_s0 = inlined_call_operand.vmem [shape: f32[5,8,32], index: 0, kind: input, shape index: {}]   ;;  %s737_s1 = inlined_call_operand.vmem [shape: f32[32,96], index: 1, kind: input, shape index: {}]   ;;  %s738_s2 = inlined_call_operand.vmem [shape: f32[32,64], index: 2, kind: input, shape index: {}]   ;;  %s739_s3 = inlined_call_operand.vmem [shape: f32[32,32], index: 3, kind: input, shape index: {}]   ;;  %s740_s4 = inlined_call_operand.vmem [shape: f32[1,96], index: 4, kind: input, shape index: {}]   ;;  %s741_s5 = inlined_call_operand.vmem [shape: f32[8,32], index: 5, kind: output, shape index: {}]  }
   0x1 LB: > { %s669_s19 = sadd.s32 4294967295, %s624_s18   ;;  %p520_p0 = scmp.ge.s32.totalorder %s624_s18, 1  ;;  %s624_s18 = sphi %s663_s18, %s15_s18  }
   0x2   : > { %p181_p1 = scmp.lt.s32.totalorder %s624_s18, 6 }
   0x4   : > { %p182_p2 = pnand %p520_p0, %p181_p1 }
   0x5   : > { %p203_p3 = scmp.lt.s32.totalorder (!%p182_p2), %s669_s19, 4  ;;  %p522_p4 = scmp.ne.s32.totalorder (!%p182_p2), %s669_s19, 0 }
   0x6   : > { %185 = sbr.rel (%p182_p2) target bundleno = 850 (0x352), region = 40 }
   0xd   : > { %s204_s20 = scalar_select %p203_p3, %s669_s19, 4 }
   0xe   : > { %210 = sbr.rel (%p522_p4) target bundleno = 21 (0x15), region = 44  ;;  %vm211_vm0 = vcmask (!%p522_p4), 261120   ;;  %v626_v0 = vmov (!%p522_p4), 0.0  }
   0xf   : > { %s521_s21 = sshll.u32 %s204_s20, 3  ;;  %212 = vst.msk [vmem:[#allocation2] sm:$0xff] (!%p522_p4), %vm211_vm0, %v626_v0 }
  0x10   : > { %s678_s24 = scalar_lea.vmem %s736_s0, %s521_s21 }
  0x15 PF: > { %v215_v1 = vld [vmem:[%s737_s1] sm:$0xff]  ;;  %v216_v2 = vld [vmem:[%s737_s1 + $0x8] sm:$0xff]  ;;  %v627_v4 = vmov 0.0|0.0   ;;  %v217_v7 = vld [vmem:[%s737_s1 + $0x10] sm:$0xff]  ;;  %vm628_vm1 = vmmov 0   ;;  %v629_v12 = vmov 0.0  }
  0x16   : > { %v300_v3 = vld [vmem:[%s738_s2] sm:$0xff]  ;;  %579 = vmatprep.subr.bf16.mxu0 %v627_v4  ;;  %v580_v5 = vpack.c.bf16 %v216_v2, %v215_v1  ;;  %585 = vmatprep.subr.bf16.mxu1 %v627_v4  ;;  %v301_v6 = vld [vmem:[%s738_s2 + $0x8] sm:$0xff]  ;;  %v218_v8 = vld [vmem:[%s737_s1 + $0x18] sm:$0xff]  ;;  %vm226_vm2 = vcmask 261120   ;;  %s630_s28 = smov 64   ;;  %s631_s29 = smov 32  }
  0x17   : > { %v586_v9 = vpack.c.bf16 %v301_v6, %v300_v3  ;;  %v302_v10 = vld [vmem:[%s738_s2 + $0x10] sm:$0xff]  ;;  %v303_v11 = vld [vmem:[%s738_s2 + $0x18] sm:$0xff]  ;;  %554 = vmatprep.mubr.msk.f32.mxu0 %vm628_vm1, %v629_v12  ;;  %565 = vmatprep.mubr.msk.f32.mxu1 %vm628_vm1, %v629_v12  ;;  %v583_v13 = vpack.c.bf16 %v218_v8, %v217_v7  ;;  %v213_v15 = vld [vmem:[%s678_s24] sm:$0xff]  ;;  %s632_s30 = smov 96   ;;  %p528_p5 = scmp.ne.s32.totalorder %s669_s19, 4 }
  0x18   : > { %581 = vmatpush3.bf16.msra.mxu0 %v580_v5  ;;  %v589_v14 = vpack.c.bf16 %v303_v11, %v302_v10  ;;  %v214_v16 = vld [vmem:[#allocation2] sm:$0xff]  ;;  %v386_v18 = vld [vmem:[%s739_s3 + $0x8] sm:$0xff]  ;;  %v387_v19 = vld [vmem:[%s739_s3 + $0x10] sm:$0xff] }
  0x19   : > { %587 = vmatpush3.bf16.msra.mxu1 %v586_v9  ;;  %582 = vmatprep.subr.bf16.mxu0 %v627_v4  ;;  %v385_v17 = vld [vmem:[%s739_s3] sm:$0xff]  ;;  %v388_v21 = vld [vmem:[%s739_s3 + $0x18] sm:$0xff] }
  0x1a   : > { %588 = vmatprep.subr.bf16.mxu1 %v627_v4  ;;  %v592_v20 = vpack.c.bf16 %v386_v18, %v385_v17  ;;  %v595_v22 = vpack.c.bf16 %v388_v21, %v387_v19  ;;  %v523_v23 = vld [vmem:[%s740_s4] ss:$0 sm:$0xff] }
  0x1c   : > { %584 = vmatpush3.bf16.msra.mxu0 %v583_v13 }
  0x1d   : > { %590 = vmatpush3.bf16.msra.mxu1 %v589_v14  ;;  %591 = vmatprep.subr.bf16.mxu0 %v627_v4 }
  0x1f   : > { %555 = vmatmul.mubr.msk.f32.vlgmr.msra.gmra.mrb[0].mxu0 %vm226_vm2, %v213_v15 }
  0x20   : > { %566 = vmatmul.mubr.msk.f32.vlgmr.msra.gmra.mrb[0].mxu1 %vm226_vm2, %v214_v16  ;;  %576 = vmatprep.mubr.msk.f32.mxu0 %vm628_vm1, %v629_v12 }
  0x21   : > { %593 = vmatpush3.bf16.msra.mxu0 %v592_v20 }
  0x22   : > { %594 = vmatprep.subr.bf16.mxu0 %v627_v4 }
  0x25   : > { %596 = vmatpush3.bf16.msra.mxu0 %v595_v22 }
  0xf2   : > { %v296_v24 = vpop.f32.mrb[0].mxu0 }
  0xf3   : > { %v297_v25 = vadd.f32 %v523_v23, %v296_v24  ;;  %v556_v26 = vpop.f32.mrb[1].mxu0  ;;  %v373_v27 = vpop.f32.mrb[0].mxu1 }
  0xf4   : > { %v567_v28 = vpop.f32.mrb[1].mxu1 }
  0xf5   : > { %v377_v29 = vadd.f32 %v373_v27, %v297_v25 }
  0xf7   : > { %v526_v30 = vmul.f32 -1.442695, %v377_v29 }
  0xf9   : > { %612 = vpow2.f32 %v526_v30 }
 0x103   : > { %v613_v31 = vpop.eup %612 }
 0x104   : > { %v381_v32 = vadd.f32 1.0, %v613_v31 }
 0x106   : > { %614 = vrcp.f32 %v381_v32 }
 0x110   : > { %v615_v33 = vpop.eup %614 }
 0x111   : > { %v384_v34 = vmul.f32 %v615_v33, %v214_v16  ;;  %v472_v41 = vsub.f32 1.0, %v615_v33 }
 0x113   : > { %577 = vmatmul.mubr.msk.f32.vlgmr.msra.gmra.mrb[2].mxu0 %vm226_vm2, %v384_v34 }
 0x1e6   : > { %v458_v35 = vpop.f32.mrb[2].mxu0 }
 0x1e7   : > { %463 = vrot.lane.b32.xlu0 %v458_v35, %s630_s28  ;;  %v578_v36 = vpop.f32.mrb[3].mxu0 }
 0x1eb   : > { %468 = vrot.lane.b32.xlu0 %v214_v16, %s631_s29 }
 0x259   : > { %v464_v37 = vpop.permute.xlu0 %463 }
 0x25a   : > { %v466_v38 = vadd.f32 %v464_v37, %v297_v25 }
 0x25c   : > { %616 = vtanh.f32 %v466_v38 }
 0x25d   : > { %v469_v40 = vpop.permute.xlu0 %468 }
 0x25e   : > { %v471_v43 = vmul.f32 %v615_v33, %v469_v40 }
 0x266   : > { %v617_v39 = vpop.eup %616 }
 0x267   : > { %474 = vrot.lane.b32.xlu1 %v617_v39, %s632_s30 }
 0x2d9   : > { %v475_v42 = vpop.permute.xlu1 %474 }
 0x2da   : > { %v477_v44 = vmul.f32 %v475_v42, %v472_v41 }
 0x2dc   : > { %v478_v45 = vadd.f32 %v477_v44, %v471_v43 }
 0x2de   : > { %480 = vrot.lane.b32.xlu1 %v478_v45, %s632_s30 }
 0x34b   : > { %487 = sbr.rel (%p528_p5) target bundleno = 850 (0x352), region = 48 }
 0x350   : > { %v481_v46 = vpop.permute.xlu1 %480 }
 0x351   : > { %483 = vst.msk [vmem:[#allocation2] sm:$0xff] %vm226_vm2, %v481_v46  ;;  %488 = vst.msk [vmem:[%s741_s5] sm:$0xff] (!%p528_p5), %vm226_vm2, %v481_v46 }
 0x352 PF: > { %s15_s18 = sadd.s32 1, %s624_s18  }
 0x353   : > { %p12_p6 = scmp.ge.s32.totalorder %s15_s18, 7  }
 0x355   :  { %14 = sbr.rel (!%p12_p6) target bundleno = 1 (0x1), region = 74 }

// kernel: casts_forward.5
= control target key start
LH: loop header
LB: loop body
LE: loop exit
PB: predicated region body
PF: predicated region fallthrough
CT: control target
= control target key end

     0   :  { %v5164_v0 = vmov 0.0   ;;  %vm38_vm0 = vcmask 64512   ;;  %vm5165_vm1 = vmmov 0   ;;  %v5166_v15 = vmov 0.0|0.0   ;;  %s5671_s0 = inlined_call_operand.vmem [shape: f32[10,8,16], index: 0, kind: input, shape index: {}]   ;;  %s5672_s1 = inlined_call_operand.vmem [shape: f32[8,8], index: 1, kind: input, shape index: {}]   ;;  %s5673_s3 = inlined_call_operand.vmem [shape: f32[16,16], index: 3, kind: input, shape index: {}]   ;;  %s5674_s2 = inlined_call_operand.vmem [shape: f32[16,16], index: 2, kind: input, shape index: {}]   ;;  %s5675_s5 = inlined_call_operand.vmem [shape: f32[16,16], index: 5, kind: input, shape index: {}]   ;;  %s5676_s4 = inlined_call_operand.vmem [shape: f32[16,16], index: 4, kind: input, shape index: {}]   ;;  %s5677_s6 = inlined_call_operand.vmem [shape: f32[10,8,16], index: 6, kind: output, shape index: {}]  }
   0x1   :  { %4621 = vmatprep.subr.mxu0 %v5164_v0  ;;  %4626 = vmatprep.subr.mxu1 %v5164_v0  ;;  %v5207_v1 = vld [vmem:[%s5671_s0] sm:$0xff]  ;;  %v5212_v2 = vld [vmem:[%s5671_s0 + $0x8] sm:$0xff]  ;;  %v5228_v4 = vld [vmem:[%s5671_s0 + $0x10] sm:$0xff]  ;;  %vm742_vm2 = vcmask 130048  }
   0x2   :  { %v5217_v3 = vld [vmem:[%s5672_s1] sm:$0xff]  ;;  %4622 = vmatpush3.msra.mxu0 %v5207_v1  ;;  %4623 = vmatprep.mubr.msk.f32.mxu0 %vm5165_vm1, %v5164_v0  ;;  %v5237_v5 = vld [vmem:[%s5671_s0 + $0x18] sm:$0xff]  ;;  %v5259_v7 = vld [vmem:[%s5671_s0 + $0x28] sm:$0xff] }
   0x3   :  { %4627 = vmatpush3.msra.mxu1 %v5212_v2  ;;  %4628 = vmatprep.mubr.msk.f32.mxu1 %vm5165_vm1, %v5164_v0  ;;  %v5250_v6 = vld [vmem:[%s5671_s0 + $0x20] sm:$0xff]  ;;  %v5272_v8 = vld [vmem:[%s5671_s0 + $0x30] sm:$0xff]  ;;  %v5281_v9 = vld [vmem:[%s5671_s0 + $0x38] sm:$0xff] }
   0x4   :  { %4624 = vmatmul.mubr.msk.f32.vlgmr.msra.gmra.mrb[0].mxu0 %vm38_vm0, %v5217_v3  ;;  %4629 = vmatmul.mubr.msk.f32.vlgmr.msra.gmra.mrb[0].mxu1 %vm38_vm0, %v5217_v3  ;;  %v5294_v10 = vld [vmem:[%s5671_s0 + $0x40] sm:$0xff]  ;;  %v37_v12 = vld [vmem:[%s5673_s3 + $0x8] sm:$0xff] }
   0x5   :  { %4631 = vmatprep.subr.mxu0 %v5164_v0  ;;  %4636 = vmatprep.subr.mxu1 %v5164_v0  ;;  %v36_v11 = vld [vmem:[%s5673_s3] sm:$0xff]  ;;  %v5309_v13 = vld [vmem:[%s5671_s0 + $0x48] sm:$0xff] }
   0x6   :  { %4632 = vmatpush3.msra.mxu0 %v5228_v4  ;;  %4633 = vmatprep.mubr.msk.f32.mxu0 %vm5165_vm1, %v5164_v0  ;;  %v5002_v14 = vpack.c.bf16 %v37_v12, %v36_v11  ;;  %v34_v28 = vld [vmem:[%s5674_s2] sm:$0xff]  ;;  %v35_v29 = vld [vmem:[%s5674_s2 + $0x8] sm:$0xff] }
   0x7   :  { %4637 = vmatpush3.msra.mxu1 %v5237_v5  ;;  %4638 = vmatprep.mubr.msk.f32.mxu1 %vm5165_vm1, %v5164_v0  ;;  %v5032_v34 = vpack.c.bf16 %v35_v29, %v34_v28  ;;  %v2215_v63 = vld [vmem:[%s5675_s5] sm:$0xff] }
   0x8   :  { %4634 = vmatmul.mubr.msk.f32.vlgmr.msra.gmra.mrb[2].mxu0 %vm38_vm0, %v5217_v3  ;;  %4639 = vmatmul.mubr.msk.f32.vlgmr.msra.gmra.mrb[2].mxu1 %vm38_vm0, %v5217_v3 }
   0x9   :  { %4641 = vmatprep.subr.mxu0 %v5164_v0  ;;  %4646 = vmatprep.subr.mxu1 %v5164_v0 }
   0xa   :  { %4642 = vmatpush3.msra.mxu0 %v5250_v6  ;;  %4643 = vmatprep.mubr.msk.f32.mxu0 %vm5165_vm1, %v5164_v0 }
   0xb   :  { %4647 = vmatpush3.msra.mxu1 %v5259_v7  ;;  %4648 = vmatprep.mubr.msk.f32.mxu1 %vm5165_vm1, %v5164_v0 }
   0xc   :  { %4644 = vmatmul.mubr.msk.f32.vlgmr.msra.gmra.mrb[4].mxu0 %vm38_vm0, %v5217_v3  ;;  %4649 = vmatmul.mubr.msk.f32.vlgmr.msra.gmra.mrb[4].mxu1 %vm38_vm0, %v5217_v3 }
   0xd   :  { %4651 = vmatprep.subr.mxu0 %v5164_v0  ;;  %4656 = vmatprep.subr.mxu1 %v5164_v0 }
   0xe   :  { %4652 = vmatpush3.msra.mxu0 %v5272_v8  ;;  %4653 = vmatprep.mubr.msk.f32.mxu0 %vm5165_vm1, %v5164_v0 }
   0xf   :  { %4657 = vmatpush3.msra.mxu1 %v5281_v9  ;;  %4658 = vmatprep.mubr.msk.f32.mxu1 %vm5165_vm1, %v5164_v0 }
  0x10   :  { %4654 = vmatmul.mubr.msk.f32.vlgmr.msra.gmra.mrb[6].mxu0 %vm38_vm0, %v5217_v3  ;;  %4659 = vmatmul.mubr.msk.f32.vlgmr.msra.gmra.mrb[6].mxu1 %vm38_vm0, %v5217_v3 }
  0x11   :  { %4661 = vmatprep.subr.mxu0 %v5164_v0  ;;  %4666 = vmatprep.subr.mxu1 %v5164_v0 }
  0x12   :  { %4662 = vmatpush3.msra.mxu0 %v5294_v10  ;;  %4663 = vmatprep.mubr.msk.f32.mxu0 %vm5165_vm1, %v5164_v0 }
  0x13   :  { %4667 = vmatpush3.msra.mxu1 %v5309_v13  ;;  %4668 = vmatprep.mubr.msk.f32.mxu1 %vm5165_vm1, %v5164_v0 }
  0x14   :  { %4664 = vmatmul.mubr.msk.f32.vlgmr.msra.gmra.mrb[8].mxu0 %vm38_vm0, %v5217_v3  ;;  %4669 = vmatmul.mubr.msk.f32.vlgmr.msra.gmra.mrb[8].mxu1 %vm38_vm0, %v5217_v3 }
  0x15   :  { %5001 = vmatprep.subr.bf16.mxu0 %v5166_v15  ;;  %5004 = vmatprep.subr.bf16.mxu1 %v5166_v15 }
  0x16   :  { %5003 = vmatpush3.bf16.msra.mxu0 %v5002_v14  ;;  %5006 = vmatpush3.bf16.msra.mxu1 %v5002_v14 }
  0x17   :  { %4675 = vmatprep.mubr.msk.f32.mxu0 %vm5165_vm1, %v5164_v0  ;;  %4682 = vmatprep.mubr.msk.f32.mxu1 %vm5165_vm1, %v5164_v0 }
  0x18   :  { %5007 = vmatprep.subr.bf16.mxu0 %v5166_v15  ;;  %5010 = vmatprep.subr.bf16.mxu1 %v5166_v15 }
  0xd7   :  { %v108_v16 = vpop.f32.mrb[0].mxu0  ;;  %v178_v17 = vpop.f32.mrb[0].mxu1 }
  0xd8   :  { %v4625_v18 = vpop.f32.mrb[1].mxu0  ;;  %v4630_v19 = vpop.f32.mrb[1].mxu1  ;;  %4676 = vmatmul.mubr.msk.f32.vlgmr.msra.gmra.mrb[10].mxu0 %vm742_vm2, %v108_v16  ;;  %4683 = vmatmul.mubr.msk.f32.vlgmr.msra.gmra.mrb[10].mxu1 %vm742_vm2, %v178_v17 }
  0xd9   :  { %5009 = vmatpush3.bf16.msra.mxu0 %v5002_v14  ;;  %5012 = vmatpush3.bf16.msra.mxu1 %v5002_v14 }
  0xda   :  { %4689 = vmatprep.mubr.msk.f32.mxu0 %vm5165_vm1, %v5164_v0  ;;  %4696 = vmatprep.mubr.msk.f32.mxu1 %vm5165_vm1, %v5164_v0 }
  0xdb   :  { %v248_v20 = vpop.f32.mrb[2].mxu0  ;;  %v318_v21 = vpop.f32.mrb[2].mxu1  ;;  %5013 = vmatprep.subr.bf16.mxu0 %v5166_v15  ;;  %5016 = vmatprep.subr.bf16.mxu1 %v5166_v15 }
  0xdc   :  { %v4635_v22 = vpop.f32.mrb[3].mxu0  ;;  %v4640_v23 = vpop.f32.mrb[3].mxu1  ;;  %4690 = vmatmul.mubr.msk.f32.vlgmr.msra.gmra.mrb[12].mxu0 %vm742_vm2, %v248_v20  ;;  %4697 = vmatmul.mubr.msk.f32.vlgmr.msra.gmra.mrb[12].mxu1 %vm742_vm2, %v318_v21 }
  0xdd   :  { %5015 = vmatpush3.bf16.msra.mxu0 %v5002_v14  ;;  %5018 = vmatpush3.bf16.msra.mxu1 %v5002_v14  ;;  %v2213_v22 = vld [vmem:[%s5676_s4] sm:$0xff]  ;;  %v2214_v23 = vld [vmem:[%s5676_s4 + $0x8] sm:$0xff] }
  0xde   :  { %4703 = vmatprep.mubr.msk.f32.mxu0 %vm5165_vm1, %v5164_v0  ;;  %4710 = vmatprep.mubr.msk.f32.mxu1 %vm5165_vm1, %v5164_v0  ;;  %v5092_v28 = vpack.c.bf16 %v2214_v23, %v2213_v22 }
  0xdf   :  { %v388_v24 = vpop.f32.mrb[4].mxu0  ;;  %v458_v25 = vpop.f32.mrb[4].mxu1  ;;  %5019 = vmatprep.subr.bf16.mxu0 %v5166_v15  ;;  %5022 = vmatprep.subr.bf16.mxu1 %v5166_v15 }
  0xe0   :  { %v4645_v26 = vpop.f32.mrb[5].mxu0  ;;  %v4650_v27 = vpop.f32.mrb[5].mxu1  ;;  %4704 = vmatmul.mubr.msk.f32.vlgmr.msra.gmra.mrb[14].mxu0 %vm742_vm2, %v388_v24  ;;  %4711 = vmatmul.mubr.msk.f32.vlgmr.msra.gmra.mrb[14].mxu1 %vm742_vm2, %v458_v25 }
  0xe1   :  { %5021 = vmatpush3.bf16.msra.mxu0 %v5002_v14  ;;  %5024 = vmatpush3.bf16.msra.mxu1 %v5002_v14 }
  0xe2   :  { %4717 = vmatprep.mubr.msk.f32.mxu0 %vm5165_vm1, %v5164_v0  ;;  %4724 = vmatprep.mubr.msk.f32.mxu1 %vm5165_vm1, %v5164_v0 }
  0xe3   :  { %v528_v30 = vpop.f32.mrb[6].mxu0  ;;  %v598_v31 = vpop.f32.mrb[6].mxu1  ;;  %5025 = vmatprep.subr.bf16.mxu0 %v5166_v15  ;;  %5028 = vmatprep.subr.bf16.mxu1 %v5166_v15 }
  0xe4   :  { %v4655_v32 = vpop.f32.mrb[7].mxu0  ;;  %v4660_v33 = vpop.f32.mrb[7].mxu1  ;;  %4718 = vmatmul.mubr.msk.f32.vlgmr.msra.gmra.mrb[16].mxu0 %vm742_vm2, %v528_v30  ;;  %4725 = vmatmul.mubr.msk.f32.vlgmr.msra.gmra.mrb[16].mxu1 %vm742_vm2, %v598_v31 }
  0xe5   :  { %5027 = vmatpush3.bf16.msra.mxu0 %v5002_v14  ;;  %5030 = vmatpush3.bf16.msra.mxu1 %v5002_v14 }
  0xe6   :  { %4731 = vmatprep.mubr.msk.f32.mxu0 %vm5165_vm1, %v5164_v0  ;;  %4738 = vmatprep.mubr.msk.f32.mxu1 %vm5165_vm1, %v5164_v0 }
  0xe7   :  { %v668_v35 = vpop.f32.mrb[8].mxu0  ;;  %v738_v36 = vpop.f32.mrb[8].mxu1  ;;  %5031 = vmatprep.subr.bf16.mxu0 %v5166_v15  ;;  %5034 = vmatprep.subr.bf16.mxu1 %v5166_v15 }
  0xe8   :  { %v4665_v37 = vpop.f32.mrb[9].mxu0  ;;  %v4670_v38 = vpop.f32.mrb[9].mxu1  ;;  %4732 = vmatmul.mubr.msk.f32.vlgmr.msra.gmra.mrb[18].mxu0 %vm742_vm2, %v668_v35  ;;  %4739 = vmatmul.mubr.msk.f32.vlgmr.msra.gmra.mrb[18].mxu1 %vm742_vm2, %v738_v36 }
  0xe9   :  { %5033 = vmatpush3.bf16.msra.mxu0 %v5032_v34  ;;  %5036 = vmatpush3.bf16.msra.mxu1 %v5032_v34 }
  0xea   :  { %4745 = vmatprep.mubr.msk.f32.mxu0 %vm5165_vm1, %v5164_v0  ;;  %4752 = vmatprep.mubr.msk.f32.mxu1 %vm5165_vm1, %v5164_v0 }
  0xeb   :  { %5037 = vmatprep.subr.bf16.mxu0 %v5166_v15  ;;  %5040 = vmatprep.subr.bf16.mxu1 %v5166_v15 }
  0xec   :  { %4746 = vmatmul.mubr.msk.f32.vlgmr.msra.gmra.mrb[10].mxu0 %vm742_vm2, %v5207_v1  ;;  %4753 = vmatmul.mubr.msk.f32.vlgmr.msra.gmra.mrb[10].mxu1 %vm742_vm2, %v5212_v2  ;;  %v2216_v1 = vld [vmem:[%s5675_s5 + $0x8] sm:$0xff] }
  0xed   :  { %5039 = vmatpush3.bf16.msra.mxu0 %v5032_v34  ;;  %5042 = vmatpush3.bf16.msra.mxu1 %v5032_v34 }
  0xee   :  { %4759 = vmatprep.mubr.msk.f32.mxu0 %vm5165_vm1, %v5164_v0  ;;  %4766 = vmatprep.mubr.msk.f32.mxu1 %vm5165_vm1, %v5164_v0 }
  0xef   :  { %5043 = vmatprep.subr.bf16.mxu0 %v5166_v15  ;;  %5046 = vmatprep.subr.bf16.mxu1 %v5166_v15 }
  0xf0   :  { %4760 = vmatmul.mubr.msk.f32.vlgmr.msra.gmra.mrb[12].mxu0 %vm742_vm2, %v5228_v4  ;;  %4767 = vmatmul.mubr.msk.f32.vlgmr.msra.gmra.mrb[12].mxu1 %vm742_vm2, %v5237_v5 }
  0xf1   :  { %5045 = vmatpush3.bf16.msra.mxu0 %v5032_v34  ;;  %5048 = vmatpush3.bf16.msra.mxu1 %v5032_v34 }
  0xf2   :  { %4773 = vmatprep.mubr.msk.f32.mxu0 %vm5165_vm1, %v5164_v0  ;;  %4780 = vmatprep.mubr.msk.f32.mxu1 %vm5165_vm1, %v5164_v0 }
  0xf3   :  { %5049 = vmatprep.subr.bf16.mxu0 %v5166_v15  ;;  %5052 = vmatprep.subr.bf16.mxu1 %v5166_v15 }
  0xf4   :  { %4774 = vmatmul.mubr.msk.f32.vlgmr.msra.gmra.mrb[14].mxu0 %vm742_vm2, %v5250_v6  ;;  %4781 = vmatmul.mubr.msk.f32.vlgmr.msra.gmra.mrb[14].mxu1 %vm742_vm2, %v5259_v7 }
  0xf5   :  { %5051 = vmatpush3.bf16.msra.mxu0 %v5032_v34  ;;  %5054 = vmatpush3.bf16.msra.mxu1 %v5032_v34 }
  0xf6   :  { %4787 = vmatprep.mubr.msk.f32.mxu0 %vm5165_vm1, %v5164_v0  ;;  %4794 = vmatprep.mubr.msk.f32.mxu1 %vm5165_vm1, %v5164_v0 }
  0xf7   :  { %5055 = vmatprep.subr.bf16.mxu0 %v5166_v15  ;;  %5058 = vmatprep.subr.bf16.mxu1 %v5166_v15 }
  0xf8   :  { %4788 = vmatmul.mubr.msk.f32.vlgmr.msra.gmra.mrb[16].mxu0 %vm742_vm2, %v5272_v8  ;;  %4795 = vmatmul.mubr.msk.f32.vlgmr.msra.gmra.mrb[16].mxu1 %vm742_vm2, %v5281_v9  ;;  %v5062_v9 = vpack.c.bf16 %v2216_v1, %v2215_v63 }
  0xf9   :  { %5057 = vmatpush3.bf16.msra.mxu0 %v5032_v34  ;;  %5060 = vmatpush3.bf16.msra.mxu1 %v5032_v34 }
  0xfa   :  { %4801 = vmatprep.mubr.msk.f32.mxu0 %vm5165_vm1, %v5164_v0  ;;  %4808 = vmatprep.mubr.msk.f32.mxu1 %vm5165_vm1, %v5164_v0 }
  0xfb   :  { %4811 = vmatprep.subr.mxu0 %v5164_v0  ;;  %4816 = vmatprep.subr.mxu1 %v5164_v0 }
  0xfc   :  { %4802 = vmatmul.mubr.msk.f32.vlgmr.msra.gmra.mrb[18].mxu0 %vm742_vm2, %v5294_v10  ;;  %4809 = vmatmul.mubr.msk.f32.vlgmr.msra.gmra.mrb[18].mxu1 %vm742_vm2, %v5309_v13 }
  0xfd   :  { %4813 = vmatprep.mubr.msk.f32.mxu0 %vm5165_vm1, %v5164_v0  ;;  %4818 = vmatprep.mubr.msk.f32.mxu1 %vm5165_vm1, %v5164_v0 }
 0x1bf   :  { %v5425_v39 = vpop.f32.mrb[10].mxu0  ;;  %v5427_v40 = vpop.f32.mrb[10].mxu1 }
 0x1c0   :  { %v2203_v41 = vmax.f32 %v5425_v39, 0.0  ;;  %v2204_v42 = vmax.f32 %v5427_v40, 0.0  ;;  %v4747_v43 = vpop.f32.mrb[11].mxu0  ;;  %v4754_v44 = vpop.f32.mrb[11].mxu1 }
 0x1c2   :  { %4812 = vmatpush3.msra.mxu0 %v2203_v41  ;;  %4817 = vmatpush3.msra.mxu1 %v2204_v42 }
 0x1c3   :  { %v5435_v45 = vpop.f32.mrb[12].mxu0  ;;  %v5437_v46 = vpop.f32.mrb[12].mxu1  ;;  %4814 = vmatmul.mubr.msk.f32.vlgmr.msra.gmra.mrb[20].mxu0 %vm38_vm0, %v5217_v3  ;;  %4819 = vmatmul.mubr.msk.f32.vlgmr.msra.gmra.mrb[20].mxu1 %vm38_vm0, %v5217_v3 }
 0x1c4   :  { %v2205_v47 = vmax.f32 %v5435_v45, 0.0  ;;  %v2206_v48 = vmax.f32 %v5437_v46, 0.0  ;;  %v4761_v49 = vpop.f32.mrb[13].mxu0  ;;  %v4768_v50 = vpop.f32.mrb[13].mxu1  ;;  %4821 = vmatprep.subr.mxu0 %v5164_v0  ;;  %4826 = vmatprep.subr.mxu1 %v5164_v0 }
 0x1c5   :  { %4823 = vmatprep.mubr.msk.f32.mxu0 %vm5165_vm1, %v5164_v0  ;;  %4828 = vmatprep.mubr.msk.f32.mxu1 %vm5165_vm1, %v5164_v0 }
 0x1c6   :  { %4822 = vmatpush3.msra.mxu0 %v2205_v47  ;;  %4827 = vmatpush3.msra.mxu1 %v2206_v48 }
 0x1c7   :  { %v5455_v51 = vpop.f32.mrb[14].mxu0  ;;  %v5457_v52 = vpop.f32.mrb[14].mxu1  ;;  %4824 = vmatmul.mubr.msk.f32.vlgmr.msra.gmra.mrb[22].mxu0 %vm38_vm0, %v5217_v3  ;;  %4829 = vmatmul.mubr.msk.f32.vlgmr.msra.gmra.mrb[22].mxu1 %vm38_vm0, %v5217_v3 }
 0x1c8   :  { %v2207_v53 = vmax.f32 %v5455_v51, 0.0  ;;  %v2208_v54 = vmax.f32 %v5457_v52, 0.0  ;;  %v4775_v55 = vpop.f32.mrb[15].mxu0  ;;  %v4782_v56 = vpop.f32.mrb[15].mxu1  ;;  %4831 = vmatprep.subr.mxu0 %v5164_v0  ;;  %4836 = vmatprep.subr.mxu1 %v5164_v0 }
 0x1c9   :  { %4833 = vmatprep.mubr.msk.f32.mxu0 %vm5165_vm1, %v5164_v0  ;;  %4838 = vmatprep.mubr.msk.f32.mxu1 %vm5165_vm1, %v5164_v0 }
 0x1ca   :  { %4832 = vmatpush3.msra.mxu0 %v2207_v53  ;;  %4837 = vmatpush3.msra.mxu1 %v2208_v54 }
 0x1cb   :  { %v5475_v57 = vpop.f32.mrb[16].mxu0  ;;  %v5477_v58 = vpop.f32.mrb[16].mxu1  ;;  %4834 = vmatmul.mubr.msk.f32.vlgmr.msra.gmra.mrb[24].mxu0 %vm38_vm0, %v5217_v3  ;;  %4839 = vmatmul.mubr.msk.f32.vlgmr.msra.gmra.mrb[24].mxu1 %vm38_vm0, %v5217_v3 }
 0x1cc   :  { %v2209_v59 = vmax.f32 %v5475_v57, 0.0  ;;  %v2210_v60 = vmax.f32 %v5477_v58, 0.0  ;;  %v4789_v61 = vpop.f32.mrb[17].mxu0  ;;  %v4796_v62 = vpop.f32.mrb[17].mxu1  ;;  %4841 = vmatprep.subr.mxu0 %v5164_v0  ;;  %4846 = vmatprep.subr.mxu1 %v5164_v0 }
 0x1cd   :  { %4843 = vmatprep.mubr.msk.f32.mxu0 %vm5165_vm1, %v5164_v0  ;;  %4848 = vmatprep.mubr.msk.f32.mxu1 %vm5165_vm1, %v5164_v0 }
 0x1ce   :  { %4842 = vmatpush3.msra.mxu0 %v2209_v59  ;;  %4847 = vmatpush3.msra.mxu1 %v2210_v60 }
 0x1cf   :  { %v5501_v2 = vpop.f32.mrb[18].mxu0  ;;  %v5503_v4 = vpop.f32.mrb[18].mxu1  ;;  %4844 = vmatmul.mubr.msk.f32.vlgmr.msra.gmra.mrb[26].mxu0 %vm38_vm0, %v5217_v3  ;;  %4849 = vmatmul.mubr.msk.f32.vlgmr.msra.gmra.mrb[26].mxu1 %vm38_vm0, %v5217_v3 }
 0x1d0   :  { %v2211_v5 = vmax.f32 %v5501_v2, 0.0  ;;  %v2212_v6 = vmax.f32 %v5503_v4, 0.0  ;;  %v4803_v7 = vpop.f32.mrb[19].mxu0  ;;  %v4810_v8 = vpop.f32.mrb[19].mxu1  ;;  %4851 = vmatprep.subr.mxu0 %v5164_v0  ;;  %4856 = vmatprep.subr.mxu1 %v5164_v0 }
 0x1d1   :  { %4853 = vmatprep.mubr.msk.f32.mxu0 %vm5165_vm1, %v5164_v0  ;;  %4858 = vmatprep.mubr.msk.f32.mxu1 %vm5165_vm1, %v5164_v0 }
 0x1d2   :  { %4852 = vmatpush3.msra.mxu0 %v2211_v5  ;;  %4857 = vmatpush3.msra.mxu1 %v2212_v6 }
 0x1d3   :  { %4854 = vmatmul.mubr.msk.f32.vlgmr.msra.gmra.mrb[28].mxu0 %vm38_vm0, %v5217_v3  ;;  %4859 = vmatmul.mubr.msk.f32.vlgmr.msra.gmra.mrb[28].mxu1 %vm38_vm0, %v5217_v3 }
 0x1d4   :  { %5061 = vmatprep.subr.bf16.mxu0 %v5166_v15  ;;  %5064 = vmatprep.subr.bf16.mxu1 %v5166_v15 }
 0x1d5   :  { %5063 = vmatpush3.bf16.msra.mxu0 %v5062_v9  ;;  %5066 = vmatpush3.bf16.msra.mxu1 %v5062_v9 }
 0x1d6   :  { %4865 = vmatprep.mubr.msk.f32.mxu0 %vm5165_vm1, %v5164_v0  ;;  %4872 = vmatprep.mubr.msk.f32.mxu1 %vm5165_vm1, %v5164_v0 }
 0x1d7   :  { %5067 = vmatprep.subr.bf16.mxu0 %v5166_v15  ;;  %5070 = vmatprep.subr.bf16.mxu1 %v5166_v15 }
 0x296   :  { %v2283_v10 = vpop.f32.mrb[20].mxu0  ;;  %v2353_v11 = vpop.f32.mrb[20].mxu1 }
 0x297   :  { %4866 = vmatmul.mubr.msk.f32.vlgmr.msra.gmra.mrb[30].mxu0 %vm742_vm2, %v2283_v10  ;;  %4873 = vmatmul.mubr.msk.f32.vlgmr.msra.gmra.mrb[30].mxu1 %vm742_vm2, %v2353_v11  ;;  %v4815_v3 = vpop.f32.mrb[21].mxu0  ;;  %v4820_v12 = vpop.f32.mrb[21].mxu1 }
 0x298   :  { %5069 = vmatpush3.bf16.msra.mxu0 %v5062_v9  ;;  %5072 = vmatpush3.bf16.msra.mxu1 %v5062_v9 }
 0x299   :  { %4879 = vmatprep.mubr.msk.f32.mxu0 %vm5165_vm1, %v5164_v0  ;;  %4886 = vmatprep.mubr.msk.f32.mxu1 %vm5165_vm1, %v5164_v0 }
 0x29a   :  { %v2423_v13 = vpop.f32.mrb[22].mxu0  ;;  %v2493_v14 = vpop.f32.mrb[22].mxu1  ;;  %5073 = vmatprep.subr.bf16.mxu0 %v5166_v15  ;;  %5076 = vmatprep.subr.bf16.mxu1 %v5166_v15 }
 0x29b   :  { %4880 = vmatmul.mubr.msk.f32.vlgmr.msra.gmra.mrb[32].mxu0 %vm742_vm2, %v2423_v13  ;;  %4887 = vmatmul.mubr.msk.f32.vlgmr.msra.gmra.mrb[32].mxu1 %vm742_vm2, %v2493_v14  ;;  %v4825_v16 = vpop.f32.mrb[23].mxu0  ;;  %v4830_v17 = vpop.f32.mrb[23].mxu1 }
 0x29c   :  { %5075 = vmatpush3.bf16.msra.mxu0 %v5062_v9  ;;  %5078 = vmatpush3.bf16.msra.mxu1 %v5062_v9 }
 0x29d   :  { %4893 = vmatprep.mubr.msk.f32.mxu0 %vm5165_vm1, %v5164_v0  ;;  %4900 = vmatprep.mubr.msk.f32.mxu1 %vm5165_vm1, %v5164_v0 }
 0x29e   :  { %v2563_v18 = vpop.f32.mrb[24].mxu0  ;;  %v2633_v19 = vpop.f32.mrb[24].mxu1  ;;  %5079 = vmatprep.subr.bf16.mxu0 %v5166_v15  ;;  %5082 = vmatprep.subr.bf16.mxu1 %v5166_v15 }
 0x29f   :  { %4894 = vmatmul.mubr.msk.f32.vlgmr.msra.gmra.mrb[34].mxu0 %vm742_vm2, %v2563_v18  ;;  %4901 = vmatmul.mubr.msk.f32.vlgmr.msra.gmra.mrb[34].mxu1 %vm742_vm2, %v2633_v19  ;;  %v4835_v20 = vpop.f32.mrb[25].mxu0  ;;  %v4840_v21 = vpop.f32.mrb[25].mxu1 }
 0x2a0   :  { %5081 = vmatpush3.bf16.msra.mxu0 %v5062_v9  ;;  %5084 = vmatpush3.bf16.msra.mxu1 %v5062_v9 }
 0x2a1   :  { %4907 = vmatprep.mubr.msk.f32.mxu0 %vm5165_vm1, %v5164_v0  ;;  %4914 = vmatprep.mubr.msk.f32.mxu1 %vm5165_vm1, %v5164_v0 }
 0x2a2   :  { %v2703_v24 = vpop.f32.mrb[26].mxu0  ;;  %v2773_v25 = vpop.f32.mrb[26].mxu1  ;;  %5085 = vmatprep.subr.bf16.mxu0 %v5166_v15  ;;  %5088 = vmatprep.subr.bf16.mxu1 %v5166_v15 }
 0x2a3   :  { %4908 = vmatmul.mubr.msk.f32.vlgmr.msra.gmra.mrb[36].mxu0 %vm742_vm2, %v2703_v24  ;;  %4915 = vmatmul.mubr.msk.f32.vlgmr.msra.gmra.mrb[36].mxu1 %vm742_vm2, %v2773_v25  ;;  %v4845_v26 = vpop.f32.mrb[27].mxu0  ;;  %v4850_v27 = vpop.f32.mrb[27].mxu1 }
 0x2a4   :  { %5087 = vmatpush3.bf16.msra.mxu0 %v5062_v9  ;;  %5090 = vmatpush3.bf16.msra.mxu1 %v5062_v9 }
 0x2a5   :  { %4921 = vmatprep.mubr.msk.f32.mxu0 %vm5165_vm1, %v5164_v0  ;;  %4928 = vmatprep.mubr.msk.f32.mxu1 %vm5165_vm1, %v5164_v0 }
 0x2a6   :  { %v2843_v29 = vpop.f32.mrb[28].mxu0  ;;  %v2913_v30 = vpop.f32.mrb[28].mxu1  ;;  %5091 = vmatprep.subr.bf16.mxu0 %v5166_v15  ;;  %5094 = vmatprep.subr.bf16.mxu1 %v5166_v15 }
 0x2a7   :  { %4922 = vmatmul.mubr.msk.f32.vlgmr.msra.gmra.mrb[38].mxu0 %vm742_vm2, %v2843_v29  ;;  %4929 = vmatmul.mubr.msk.f32.vlgmr.msra.gmra.mrb[38].mxu1 %vm742_vm2, %v2913_v30  ;;  %v4855_v31 = vpop.f32.mrb[29].mxu0  ;;  %v4860_v32 = vpop.f32.mrb[29].mxu1 }
 0x2a8   :  { %5093 = vmatpush3.bf16.msra.mxu0 %v5092_v28  ;;  %5096 = vmatpush3.bf16.msra.mxu1 %v5092_v28 }
 0x2a9   :  { %4935 = vmatprep.mubr.msk.f32.mxu0 %vm5165_vm1, %v5164_v0  ;;  %4942 = vmatprep.mubr.msk.f32.mxu1 %vm5165_vm1, %v5164_v0 }
 0x2aa   :  { %5097 = vmatprep.subr.bf16.mxu0 %v5166_v15  ;;  %5100 = vmatprep.subr.bf16.mxu1 %v5166_v15 }
 0x2ab   :  { %4936 = vmatmul.mubr.msk.f32.vlgmr.msra.gmra.mrb[30].mxu0 %vm742_vm2, %v2203_v41  ;;  %4943 = vmatmul.mubr.msk.f32.vlgmr.msra.gmra.mrb[30].mxu1 %vm742_vm2, %v2204_v42 }
 0x2ac   :  { %5099 = vmatpush3.bf16.msra.mxu0 %v5092_v28  ;;  %5102 = vmatpush3.bf16.msra.mxu1 %v5092_v28 }
 0x2ad   :  { %4949 = vmatprep.mubr.msk.f32.mxu0 %vm5165_vm1, %v5164_v0  ;;  %4956 = vmatprep.mubr.msk.f32.mxu1 %vm5165_vm1, %v5164_v0 }
 0x2ae   :  { %5103 = vmatprep.subr.bf16.mxu0 %v5166_v15  ;;  %5106 = vmatprep.subr.bf16.mxu1 %v5166_v15 }
 0x2af   :  { %4950 = vmatmul.mubr.msk.f32.vlgmr.msra.gmra.mrb[32].mxu0 %vm742_vm2, %v2205_v47  ;;  %4957 = vmatmul.mubr.msk.f32.vlgmr.msra.gmra.mrb[32].mxu1 %vm742_vm2, %v2206_v48 }
 0x2b0   :  { %5105 = vmatpush3.bf16.msra.mxu0 %v5092_v28  ;;  %5108 = vmatpush3.bf16.msra.mxu1 %v5092_v28 }
 0x2b1   :  { %4963 = vmatprep.mubr.msk.f32.mxu0 %vm5165_vm1, %v5164_v0  ;;  %4970 = vmatprep.mubr.msk.f32.mxu1 %vm5165_vm1, %v5164_v0 }
 0x2b2   :  { %5109 = vmatprep.subr.bf16.mxu0 %v5166_v15  ;;  %5112 = vmatprep.subr.bf16.mxu1 %v5166_v15 }
 0x2b3   :  { %4964 = vmatmul.mubr.msk.f32.vlgmr.msra.gmra.mrb[34].mxu0 %vm742_vm2, %v2207_v53  ;;  %4971 = vmatmul.mubr.msk.f32.vlgmr.msra.gmra.mrb[34].mxu1 %vm742_vm2, %v2208_v54 }
 0x2b4   :  { %5111 = vmatpush3.bf16.msra.mxu0 %v5092_v28  ;;  %5114 = vmatpush3.bf16.msra.mxu1 %v5092_v28 }
 0x2b5   :  { %4977 = vmatprep.mubr.msk.f32.mxu0 %vm5165_vm1, %v5164_v0  ;;  %4984 = vmatprep.mubr.msk.f32.mxu1 %vm5165_vm1, %v5164_v0 }
 0x2b6   :  { %5115 = vmatprep.subr.bf16.mxu0 %v5166_v15  ;;  %5118 = vmatprep.subr.bf16.mxu1 %v5166_v15 }
 0x2b7   :  { %4978 = vmatmul.mubr.msk.f32.vlgmr.msra.gmra.mrb[36].mxu0 %vm742_vm2, %v2209_v59  ;;  %4985 = vmatmul.mubr.msk.f32.vlgmr.msra.gmra.mrb[36].mxu1 %vm742_vm2, %v2210_v60 }
 0x2b8   :  { %5117 = vmatpush3.bf16.msra.mxu0 %v5092_v28  ;;  %5120 = vmatpush3.bf16.msra.mxu1 %v5092_v28 }
 0x2b9   :  { %4991 = vmatprep.mubr.msk.f32.mxu0 %vm5165_vm1, %v5164_v0  ;;  %4998 = vmatprep.mubr.msk.f32.mxu1 %vm5165_vm1, %v5164_v0 }
 0x2bb   :  { %4992 = vmatmul.mubr.msk.f32.vlgmr.msra.gmra.mrb[38].mxu0 %vm742_vm2, %v2211_v5  ;;  %4999 = vmatmul.mubr.msk.f32.vlgmr.msra.gmra.mrb[38].mxu1 %vm742_vm2, %v2212_v6 }
 0x37e   :  { %v3716_v15 = vpop.f32.mrb[30].mxu0  ;;  %v3789_v33 = vpop.f32.mrb[30].mxu1 }
 0x37f   :  { %v4377_v34 = vmax.f32 %v3716_v15, 0.0  ;;  %v4378_v35 = vmax.f32 %v3789_v33, 0.0  ;;  %v4937_v36 = vpop.f32.mrb[31].mxu0  ;;  %v4944_v37 = vpop.f32.mrb[31].mxu1 }
 0x381   :  { %4387 = vst.msk [vmem:[%s5677_s6] sm:$0xff] %vm742_vm2, %v4377_v34  ;;  %4388 = vst.msk [vmem:[%s5677_s6 + $0x8] sm:$0xff] %vm742_vm2, %v4378_v35 }
 0x382   :  { %v3862_v0 = vpop.f32.mrb[32].mxu0  ;;  %v3935_v38 = vpop.f32.mrb[32].mxu1 }
 0x383   :  { %v4379_v39 = vmax.f32 %v3862_v0, 0.0  ;;  %v4380_v40 = vmax.f32 %v3935_v38, 0.0  ;;  %v4951_v41 = vpop.f32.mrb[33].mxu0  ;;  %v4958_v42 = vpop.f32.mrb[33].mxu1 }
 0x385   :  { %4389 = vst.msk [vmem:[%s5677_s6 + $0x10] sm:$0xff] %vm742_vm2, %v4379_v39  ;;  %4390 = vst.msk [vmem:[%s5677_s6 + $0x18] sm:$0xff] %vm742_vm2, %v4380_v40 }
 0x386   :  { %v4008_v43 = vpop.f32.mrb[34].mxu0  ;;  %v4081_v44 = vpop.f32.mrb[34].mxu1 }
 0x387   :  { %v4381_v45 = vmax.f32 %v4008_v43, 0.0  ;;  %v4382_v46 = vmax.f32 %v4081_v44, 0.0  ;;  %v4965_v47 = vpop.f32.mrb[35].mxu0  ;;  %v4972_v48 = vpop.f32.mrb[35].mxu1 }
 0x389   :  { %4391 = vst.msk [vmem:[%s5677_s6 + $0x20] sm:$0xff] %vm742_vm2, %v4381_v45  ;;  %4392 = vst.msk [vmem:[%s5677_s6 + $0x28] sm:$0xff] %vm742_vm2, %v4382_v46 }
 0x38a   :  { %v4154_v49 = vpop.f32.mrb[36].mxu0  ;;  %v4227_v50 = vpop.f32.mrb[36].mxu1 }
 0x38b   :  { %v4383_v51 = vmax.f32 %v4154_v49, 0.0  ;;  %v4384_v52 = vmax.f32 %v4227_v50, 0.0  ;;  %v4979_v53 = vpop.f32.mrb[37].mxu0  ;;  %v4986_v54 = vpop.f32.mrb[37].mxu1 }
 0x38d   :  { %4393 = vst.msk [vmem:[%s5677_s6 + $0x30] sm:$0xff] %vm742_vm2, %v4383_v51  ;;  %4394 = vst.msk [vmem:[%s5677_s6 + $0x38] sm:$0xff] %vm742_vm2, %v4384_v52 }
 0x38e   :  { %v4300_v55 = vpop.f32.mrb[38].mxu0  ;;  %v4373_v56 = vpop.f32.mrb[38].mxu1 }
 0x38f   :  { %v4385_v57 = vmax.f32 %v4300_v55, 0.0  ;;  %v4386_v58 = vmax.f32 %v4373_v56, 0.0  ;;  %v4993_v59 = vpop.f32.mrb[39].mxu0  ;;  %v5000_v60 = vpop.f32.mrb[39].mxu1 }
 0x391   :  { %4395 = vst.msk [vmem:[%s5677_s6 + $0x40] sm:$0xff] %vm742_vm2, %v4385_v57  ;;  %4396 = vst.msk [vmem:[%s5677_s6 + $0x48] sm:$0xff] %vm742_vm2, %v4386_v58 }

</bundles_post_ra>
